<compile_context>
chip_gen: v7x
topology: tpu7x:2x2x1
jax: 0.10.0
libtpu: 0.0.40
codegen_flags: <defaults>
</compile_context>

<pallas_src>
import math
from functools import partial

import jax
import jax.numpy as jnp
import numpy as np
from jax.experimental import pallas as pl
from jax.experimental.pallas import tpu as pltpu


def _round_up(x, m):
    return ((x + m - 1) // m) * m


def gate_ab_mil_kernel(x_ref, wf_ref, bf_ref, wab_ref, wc_ref, wcls_ref,
                       logits_ref, attn_ref, feat_ref,
                       m_sc, s_sc, acc_sc,
                       *, n_valid, tile_n, d_attn):
    i = pl.program_id(0)
    n_tiles = pl.num_programs(0)

    @pl.when(i == 0)
    def _init():
        m_sc[...] = jnp.full_like(m_sc, -1e30)
        s_sc[...] = jnp.zeros_like(s_sc)
        acc_sc[...] = jnp.zeros_like(acc_sc)

    # ---- feature: Linear(in_dim, L) + ReLU (dropout=0 -> identity) ----
    x = x_ref[...]                                               # (tN, in_dim) bf16
    h = jnp.dot(x, wf_ref[...], preferred_element_type=jnp.float32)
    h = jnp.maximum(h + bf_ref[...], 0.0)                        # (tN, L) f32

    # ---- gated attention: fused a|b projection, one 2D-wide matmul ----
    ab = jnp.dot(h.astype(jnp.bfloat16), wab_ref[...],
                 preferred_element_type=jnp.float32)             # (tN, 2D) f32
    a = ab[:, :d_attn]
    b = jax.nn.sigmoid(ab[:, d_attn:])
    gated = a * b                                                # (tN, D) f32

    # attention_c has output width 1 -> VPU multiply + lane reduce (no MXU push)
    A = jnp.sum(gated * wc_ref[...], axis=-1, keepdims=True)     # (tN, 1) f32
    attn_ref[...] = A                                            # A_ori (pre-softmax)

    # ---- online softmax over the instance axis + pooled accumulation ----
    rows = i * tile_n + jax.lax.broadcasted_iota(jnp.int32, (tile_n, 1), 0)
    valid = rows < n_valid
    A_m = jnp.where(valid, A, -1e30)

    m_prev = m_sc[...]                                           # (1, 1)
    m_new = jnp.maximum(m_prev, jnp.max(A_m))                    # (1, 1)
    alpha = jnp.exp(m_prev - m_new)                              # rescale factor
    e = jnp.where(valid, jnp.exp(A_m - m_new), 0.0)              # (tN, 1)

    s_sc[...] = alpha * s_sc[...] + jnp.sum(e)
    acc_sc[...] = alpha * acc_sc[...] + jnp.sum(e * h, axis=0, keepdims=True)
    m_sc[...] = m_new

    @pl.when(i == n_tiles - 1)
    def _finalize():
        pooled = acc_sc[...] / s_sc[...]                         # (1, L) f32
        feat_ref[...] = pooled
        logits_ref[...] = jnp.dot(pooled, wcls_ref[...],
                                  preferred_element_type=jnp.float32)


def gate_ab_mil_forward(x, params, return_WSI_attn=False, return_WSI_feature=False,
                        tile_n=1024):
    """x: (1, N, in_dim) float32. params: dict from init_params (f32 canonical)."""
    x2d = jnp.squeeze(x, axis=0)                                 # glue: x.squeeze(0)
    N, in_dim = x2d.shape
    L = params["w_feat"].shape[1]
    D = params["w_a"].shape[1]
    C = params["w_cls"].shape[1]

    # Tile the instance axis; pad with zero rows so block loads never run OOB.
    tn = min(tile_n, _round_up(N, 8))
    n_pad = pl.cdiv(N, tn) * tn
    if n_pad != N:
        x2d = jnp.pad(x2d, ((0, n_pad - N), (0, 0)))
    grid = (n_pad // tn,)

    # bf16 MXU operands (f32 accumulation stays in the kernel); halves x traffic.
    x_bf = x2d.astype(jnp.bfloat16)
    wf_bf = params["w_feat"].astype(jnp.bfloat16)                # (in_dim, L)
    wab_bf = jnp.concatenate([params["w_a"], params["w_b"]],
                             axis=1).astype(jnp.bfloat16)        # (L, 2D)
    b_feat = params["b_feat"]                                    # (1, L) f32
    wc_row = params["w_c"]                                       # (1, D) f32
    w_cls = params["w_cls"]                                      # (L, C) f32

    kernel = partial(gate_ab_mil_kernel, n_valid=N, tile_n=tn, d_attn=D)

    logits, A_pad, pooled = pl.pallas_call(
        kernel,
        out_shape=(
            jax.ShapeDtypeStruct((1, C), jnp.float32),
            jax.ShapeDtypeStruct((n_pad, 1), jnp.float32),
            jax.ShapeDtypeStruct((1, L), jnp.float32),
        ),
        grid=grid,
        in_specs=[
            pl.BlockSpec((tn, in_dim), lambda i: (i, 0)),        # streamed x tile
            pl.BlockSpec((in_dim, L), lambda i: (0, 0)),         # weights: VMEM-resident
            pl.BlockSpec((1, L), lambda i: (0, 0)),
            pl.BlockSpec((L, 2 * D), lambda i: (0, 0)),
            pl.BlockSpec((1, D), lambda i: (0, 0)),
            pl.BlockSpec((L, C), lambda i: (0, 0)),
        ],
        out_specs=(
            pl.BlockSpec((1, C), lambda i: (0, 0)),              # logits (written last step)
            pl.BlockSpec((tn, 1), lambda i: (i, 0)),             # A_ori per tile
            pl.BlockSpec((1, L), lambda i: (0, 0)),              # pooled feature
        ),
        scratch_shapes=[
            pltpu.VMEM((1, 1), jnp.float32),                     # running max
            pltpu.VMEM((1, 1), jnp.float32),                     # running sum
            pltpu.VMEM((1, L), jnp.float32),                     # pooled accumulator
        ],
        compiler_params=pltpu.CompilerParams(
            dimension_semantics=("arbitrary",),                  # N is a reduction axis
            vmem_limit_bytes=32 * 1024 * 1024,                   # safe on v5e/v6e/v7x
        ),
    )(x_bf, wf_bf, b_feat, wab_bf, wc_row, w_cls)

    out = {"logits": logits}
    if return_WSI_feature:
        out["WSI_feature"] = pooled
    if return_WSI_attn:
        out["WSI_attn"] = A_pad[:N]
    return out


# ----------------------------- parameters -----------------------------------

def xavier_normal(key, out_features, in_features):
    # matches nn.init.xavier_normal_ on a (out, in) Linear weight
    std = math.sqrt(2.0 / (in_features + out_features))
    return std * jax.random.normal(key, (out_features, in_features), dtype=jnp.float32)


def init_params(key, in_dim=512, L=512, D=128, num_classes=2):
    k1, k2, k3, k4, k5 = jax.random.split(key, 5)
    w_feat = xavier_normal(k1, L, in_dim)          # feature Linear(in_dim, 512)
    b_feat = jnp.zeros((1, L), dtype=jnp.float32)  # bias zeroed by initialize_weights
    w_a = xavier_normal(k2, D, L)                  # attention_a Linear(L, D, bias=False)
    w_b = xavier_normal(k3, D, L)                  # attention_b Linear(L, D, bias=False)
    w_c = xavier_normal(k4, 1, D)                  # attention_c Linear(D, 1, bias=False)
    w_cls = xavier_normal(k5, num_classes, L)      # classifier Linear(L, C, bias=False)
    return {
        "w_feat": w_feat.T,   # (in_dim, L)
        "b_feat": b_feat,     # (1, L)
        "w_a": w_a.T,         # (L, D)
        "w_b": w_b.T,         # (L, D)
        "w_c": w_c,           # (1, D) row, used as VPU reduce weights
        "w_cls": w_cls.T,     # (L, C)
    }


def gate_ab_mil_reference(x, params):
    """Pure-JAX f32 reference (mirrors the PyTorch forward)."""
    x2d = jnp.squeeze(x, axis=0)
    h = jax.nn.relu(x2d @ params["w_feat"] + params["b_feat"])
    a = h @ params["w_a"]
    b = jax.nn.sigmoid(h @ params["w_b"])
    A = (a * b) @ params["w_c"].T                     # (N, 1)
    w = jax.nn.softmax(A.T, axis=-1)                  # (1, N)
    pooled = w @ h                                    # (1, L)
    logits = pooled @ params["w_cls"]                 # (1, C)
    return logits, A, pooled


if __name__ == "__main__":
    key = jax.random.PRNGKey(0)
    k_x, k_p = jax.random.split(key)

    in_dim, L, D, num_classes = 512, 512, 128, 2
    N = 8  # number of instances in the bag (small demo bag)

    x = jax.random.normal(k_x, (1, N, in_dim), dtype=jnp.float32)
    params = init_params(k_p, in_dim=in_dim, L=L, D=D, num_classes=num_classes)

    out = gate_ab_mil_forward(x, params, return_WSI_attn=True, return_WSI_feature=True)
    jax.block_until_ready(out["logits"])
    jax.block_until_ready(out["WSI_attn"])
    jax.block_until_ready(out["WSI_feature"])

    assert out["logits"].shape == (1, num_classes)
    assert out["WSI_attn"].shape == (N, 1)
    assert out["WSI_feature"].shape == (1, L)

    # Loose-tolerance check vs f32 reference (kernel uses bf16 MXU operands).
    ref_logits, ref_attn, ref_pooled = gate_ab_mil_reference(x, params)
    np.testing.assert_allclose(np.asarray(out["logits"]), np.asarray(ref_logits),
                               rtol=5e-2, atol=5e-2)
    np.testing.assert_allclose(np.asarray(out["WSI_attn"]), np.asarray(ref_attn),
                               rtol=5e-2, atol=5e-2)
    np.testing.assert_allclose(np.asarray(out["WSI_feature"]), np.asarray(ref_pooled),
                               rtol=5e-2, atol=5e-2)

    print("KERNEL_OK")
</pallas_src>

<mosaic_0001>
module attributes {stable_mosaic.version = 11 : i64} {
  func.func @gate_ab_mil_kernel(%arg0: i32, %arg1: memref<8x512xbf16, #tpu.memory_space<vmem>>, %arg2: memref<512x512xbf16, #tpu.memory_space<vmem>>, %arg3: memref<1x512xf32, #tpu.memory_space<vmem>>, %arg4: memref<512x256xbf16, #tpu.memory_space<vmem>>, %arg5: memref<1x128xf32, #tpu.memory_space<vmem>>, %arg6: memref<512x2xf32, #tpu.memory_space<vmem>>, %arg7: memref<1x2xf32, #tpu.memory_space<vmem>>, %arg8: memref<8x1xf32, #tpu.memory_space<vmem>>, %arg9: memref<1x512xf32, #tpu.memory_space<vmem>>, %arg10: memref<1x1xf32, #tpu.memory_space<vmem>>, %arg11: memref<1x1xf32, #tpu.memory_space<vmem>>, %arg12: memref<1x512xf32, #tpu.memory_space<vmem>>) attributes {dimension_semantics = [#tpu.dimension_semantics<arbitrary>], iteration_bounds = array<i64: 1>, scalar_prefetch = 0 : i64, scratch_operands = 3 : i64, tpu.core_type = #tpu.core_type<tc>, window_params = [{transform_indices = @transform_0, window_bounds = array<i64: 8, 512>}, {pipeline_mode = #tpu.pipeline_mode<synchronous>, transform_indices = @transform_1, window_bounds = array<i64: 512, 512>}, {pipeline_mode = #tpu.pipeline_mode<synchronous>, transform_indices = @transform_2, window_bounds = array<i64: 1, 512>}, {pipeline_mode = #tpu.pipeline_mode<synchronous>, transform_indices = @transform_3, window_bounds = array<i64: 512, 256>}, {pipeline_mode = #tpu.pipeline_mode<synchronous>, transform_indices = @transform_4, window_bounds = array<i64: 1, 128>}, {pipeline_mode = #tpu.pipeline_mode<synchronous>, transform_indices = @transform_5, window_bounds = array<i64: 512, 2>}, {pipeline_mode = #tpu.pipeline_mode<synchronous>, transform_indices = @transform_6, window_bounds = array<i64: 1, 2>}, {transform_indices = @transform_7, window_bounds = array<i64: 8, 1>}, {pipeline_mode = #tpu.pipeline_mode<synchronous>, transform_indices = @transform_8, window_bounds = array<i64: 1, 512>}]} {
    %c0_i32 = arith.constant 0 : i32
    %0 = arith.cmpi eq, %arg0, %c0_i32 : i32
    %1 = arith.extui %0 : i1 to i32
    %c0_i32_0 = arith.constant 0 : i32
    %2 = arith.cmpi ne, %1, %c0_i32_0 : i32
    scf.if %2 {
      %cst_36 = arith.constant -1.000000e+30 : f32
      %72 = vector.broadcast %cst_36 : f32 to vector<1x1xf32>
      %c0_37 = arith.constant 0 : index
      %c0_38 = arith.constant 0 : index
      %73 = vector.load %arg10[%c0_37, %c0_38] : memref<1x1xf32, #tpu.memory_space<vmem>>, vector<1x1xf32>
      tpu.vector_store %arg10[%c0_37, %c0_38], %72 {strides = array<i32>} : memref<1x1xf32, #tpu.memory_space<vmem>>, vector<1x1xf32>,
      %cst_39 = arith.constant 0.000000e+00 : f32
      %74 = vector.broadcast %cst_39 : f32 to vector<1x1xf32>
      %c0_40 = arith.constant 0 : index
      %c0_41 = arith.constant 0 : index
      %75 = vector.load %arg11[%c0_40, %c0_41] : memref<1x1xf32, #tpu.memory_space<vmem>>, vector<1x1xf32>
      tpu.vector_store %arg11[%c0_40, %c0_41], %74 {strides = array<i32>} : memref<1x1xf32, #tpu.memory_space<vmem>>, vector<1x1xf32>,
      %cst_42 = arith.constant 0.000000e+00 : f32
      %76 = vector.broadcast %cst_42 : f32 to vector<1x512xf32>
      %c0_43 = arith.constant 0 : index
      %c0_44 = arith.constant 0 : index
      %77 = vector.load %arg12[%c0_43, %c0_44] : memref<1x512xf32, #tpu.memory_space<vmem>>, vector<1x512xf32>
      tpu.vector_store %arg12[%c0_43, %c0_44], %76 {strides = array<i32>} : memref<1x512xf32, #tpu.memory_space<vmem>>, vector<1x512xf32>,
    } else {
    }
    %c0 = arith.constant 0 : index
    %c0_1 = arith.constant 0 : index
    %3 = vector.load %arg1[%c0, %c0_1] : memref<8x512xbf16, #tpu.memory_space<vmem>>, vector<8x512xbf16>
    %c0_2 = arith.constant 0 : index
    %c0_3 = arith.constant 0 : index
    %4 = vector.load %arg2[%c0_2, %c0_3] : memref<512x512xbf16, #tpu.memory_space<vmem>>, vector<512x512xbf16>
    %cst = arith.constant dense<0.000000e+00> : vector<8x512xf32>
    %5 = tpu.matmul %3, %4, %cst {dimension_numbers = #tpu.dot_dimension_numbers<[1], [0], [0], [1], [0, 0, 1, 1], [], []>} : vector<8x512xbf16>, vector<512x512xbf16>, vector<8x512xf32> -> vector<8x512xf32>
    %c0_4 = arith.constant 0 : index
    %c0_5 = arith.constant 0 : index
    %6 = vector.load %arg3[%c0_4, %c0_5] : memref<1x512xf32, #tpu.memory_space<vmem>>, vector<1x512xf32>
    %7 = vector.broadcast %6 : vector<1x512xf32> to vector<8x512xf32>
    %8 = arith.addf %5, %7 : vector<8x512xf32>
    %cst_6 = arith.constant 0.000000e+00 : f32
    %9 = vector.broadcast %cst_6 : f32 to vector<8x512xf32>
    %10 = arith.maximumf %8, %9 : vector<8x512xf32>
    %11 = arith.truncf %10 : vector<8x512xf32> to vector<8x512xbf16>
    %c0_7 = arith.constant 0 : index
    %c0_8 = arith.constant 0 : index
    %12 = vector.load %arg4[%c0_7, %c0_8] : memref<512x256xbf16, #tpu.memory_space<vmem>>, vector<512x256xbf16>
    %cst_9 = arith.constant dense<0.000000e+00> : vector<8x256xf32>
    %13 = tpu.matmul %11, %12, %cst_9 {dimension_numbers = #tpu.dot_dimension_numbers<[1], [0], [0], [1], [0, 0, 1, 1], [], []>} : vector<8x512xbf16>, vector<512x256xbf16>, vector<8x256xf32> -> vector<8x256xf32>
    %14 = vector.extract_strided_slice %13 {offsets = [0, 0], sizes = [8, 128], strides = [1, 1]} : vector<8x256xf32> to vector<8x128xf32>
    %15 = vector.extract_strided_slice %13 {offsets = [0, 128], sizes = [8, 128], strides = [1, 1]} : vector<8x256xf32> to vector<8x128xf32>
    %16 = arith.negf %15 : vector<8x128xf32>
    %17 = math.exp %16 : vector<8x128xf32>
    %cst_10 = arith.constant 1.000000e+00 : f32
    %18 = vector.broadcast %cst_10 : f32 to vector<8x128xf32>
    %19 = arith.addf %18, %17 : vector<8x128xf32>
    %20 = arith.divf %18, %19 : vector<8x128xf32>
    %21 = arith.mulf %14, %20 : vector<8x128xf32>
    %c0_11 = arith.constant 0 : index
    %c0_12 = arith.constant 0 : index
    %22 = vector.load %arg5[%c0_11, %c0_12] : memref<1x128xf32, #tpu.memory_space<vmem>>, vector<1x128xf32>
    %23 = vector.broadcast %22 : vector<1x128xf32> to vector<8x128xf32>
    %24 = arith.mulf %21, %23 : vector<8x128xf32>
    %cst_13 = arith.constant dense<0.000000e+00> : vector<8xf32>
    %25 = vector.multi_reduction <add>, %24, %cst_13 [1] : vector<8x128xf32> to vector<8xf32>
    %26 = vector.shape_cast %25 : vector<8xf32> to vector<8x1xf32>
    %c0_14 = arith.constant 0 : index
    %c0_15 = arith.constant 0 : index
    %27 = vector.load %arg8[%c0_14, %c0_15] : memref<8x1xf32, #tpu.memory_space<vmem>>, vector<8x1xf32>
    tpu.vector_store %arg8[%c0_14, %c0_15], %26 {strides = array<i32>} : memref<8x1xf32, #tpu.memory_space<vmem>>, vector<8x1xf32>,
    %c8_i32 = arith.constant 8 : i32
    %28 = arith.muli %arg0, %c8_i32 : i32
    %29 = tpu.iota {dimensions = array<i32: 0>} : vector<8x1xi32>
    %30 = vector.broadcast %28 : i32 to vector<8x1xi32>
    %31 = arith.addi %30, %29 : vector<8x1xi32>
    %c8_i32_16 = arith.constant 8 : i32
    %32 = vector.broadcast %c8_i32_16 : i32 to vector<8x1xi32>
    %33 = arith.cmpi slt, %31, %32 : vector<8x1xi32>
    %cst_17 = arith.constant -1.000000e+30 : f32
    %34 = vector.broadcast %cst_17 : f32 to vector<8x1xf32>
    %35 = arith.select %33, %26, %34 : vector<8x1xi1>, vector<8x1xf32>
    %c0_18 = arith.constant 0 : index
    %c0_19 = arith.constant 0 : index
    %36 = vector.load %arg10[%c0_18, %c0_19] : memref<1x1xf32, #tpu.memory_space<vmem>>, vector<1x1xf32>
    %37 = vector.shape_cast %35 : vector<8x1xf32> to vector<1x8x1xf32>
    %cst_20 = arith.constant dense<0xFF800000> : vector<1xf32>
    %38 = vector.multi_reduction <maximumf>, %37, %cst_20 [1, 2] : vector<1x8x1xf32> to vector<1xf32>
    %39 = vector.shape_cast %38 : vector<1xf32> to vector<1x1x1xf32>
    %40 = vector.extract %39[0, 0, 0] : f32 from vector<1x1x1xf32>
    %41 = vector.broadcast %40 : f32 to vector<1x1xf32>
    %42 = arith.maximumf %36, %41 : vector<1x1xf32>
    %43 = arith.subf %36, %42 : vector<1x1xf32>
    %44 = math.exp %43 : vector<1x1xf32>
    %45 = vector.broadcast %42 : vector<1x1xf32> to vector<8x1xf32>
    %46 = arith.subf %35, %45 : vector<8x1xf32>
    %47 = math.exp %46 : vector<8x1xf32>
    %cst_21 = arith.constant 0.000000e+00 : f32
    %48 = vector.broadcast %cst_21 : f32 to vector<8x1xf32>
    %49 = arith.select %33, %47, %48 : vector<8x1xi1>, vector<8x1xf32>
    %c0_22 = arith.constant 0 : index
    %c0_23 = arith.constant 0 : index
    %50 = vector.load %arg11[%c0_22, %c0_23] : memref<1x1xf32, #tpu.memory_space<vmem>>, vector<1x1xf32>
    %51 = arith.mulf %44, %50 : vector<1x1xf32>
    %52 = vector.shape_cast %49 : vector<8x1xf32> to vector<1x8x1xf32>
    %cst_24 = arith.constant dense<0.000000e+00> : vector<1xf32>
    %53 = vector.multi_reduction <add>, %52, %cst_24 [1, 2] : vector<1x8x1xf32> to vector<1xf32>
    %54 = vector.shape_cast %53 : vector<1xf32> to vector<1x1x1xf32>
    %55 = vector.extract %54[0, 0, 0] : f32 from vector<1x1x1xf32>
    %56 = vector.broadcast %55 : f32 to vector<1x1xf32>
    %57 = arith.addf %51, %56 : vector<1x1xf32>
    %c0_25 = arith.constant 0 : index
    %c0_26 = arith.constant 0 : index
    %58 = vector.load %arg11[%c0_25, %c0_26] : memref<1x1xf32, #tpu.memory_space<vmem>>, vector<1x1xf32>
    tpu.vector_store %arg11[%c0_25, %c0_26], %57 {strides = array<i32>} : memref<1x1xf32, #tpu.memory_space<vmem>>, vector<1x1xf32>,
    %c0_27 = arith.constant 0 : index
    %c0_28 = arith.constant 0 : index
    %59 = vector.load %arg12[%c0_27, %c0_28] : memref<1x512xf32, #tpu.memory_space<vmem>>, vector<1x512xf32>
    %60 = vector.broadcast %44 : vector<1x1xf32> to vector<1x512xf32>
    %61 = arith.mulf %60, %59 : vector<1x512xf32>
    %62 = vector.broadcast %49 : vector<8x1xf32> to vector<8x512xf32>
    %63 = arith.mulf %62, %10 : vector<8x512xf32>
    %cst_29 = arith.constant dense<0.000000e+00> : vector<512xf32>
    %64 = vector.multi_reduction <add>, %63, %cst_29 [0] : vector<8x512xf32> to vector<512xf32>
    %65 = vector.shape_cast %64 : vector<512xf32> to vector<1x512xf32>
    %66 = arith.addf %61, %65 : vector<1x512xf32>
    %c0_30 = arith.constant 0 : index
    %c0_31 = arith.constant 0 : index
    %67 = vector.load %arg12[%c0_30, %c0_31] : memref<1x512xf32, #tpu.memory_space<vmem>>, vector<1x512xf32>
    tpu.vector_store %arg12[%c0_30, %c0_31], %66 {strides = array<i32>} : memref<1x512xf32, #tpu.memory_space<vmem>>, vector<1x512xf32>,
    %c0_32 = arith.constant 0 : index
    %c0_33 = arith.constant 0 : index
    %68 = vector.load %arg10[%c0_32, %c0_33] : memref<1x1xf32, #tpu.memory_space<vmem>>, vector<1x1xf32>
    tpu.vector_store %arg10[%c0_32, %c0_33], %42 {strides = array<i32>} : memref<1x1xf32, #tpu.memory_space<vmem>>, vector<1x1xf32>,
    %c0_i32_34 = arith.constant 0 : i32
    %69 = arith.cmpi eq, %arg0, %c0_i32_34 : i32
    %70 = arith.extui %69 : i1 to i32
    %c0_i32_35 = arith.constant 0 : i32
    %71 = arith.cmpi ne, %70, %c0_i32_35 : i32
    scf.if %71 {
      %c0_36 = arith.constant 0 : index
      %c0_37 = arith.constant 0 : index
      %72 = vector.load %arg12[%c0_36, %c0_37] : memref<1x512xf32, #tpu.memory_space<vmem>>, vector<1x512xf32>
      %c0_38 = arith.constant 0 : index
      %c0_39 = arith.constant 0 : index
      %73 = vector.load %arg11[%c0_38, %c0_39] : memref<1x1xf32, #tpu.memory_space<vmem>>, vector<1x1xf32>
      %74 = vector.broadcast %73 : vector<1x1xf32> to vector<1x512xf32>
      %75 = arith.divf %72, %74 : vector<1x512xf32>
      %c0_40 = arith.constant 0 : index
      %c0_41 = arith.constant 0 : index
      %76 = vector.load %arg9[%c0_40, %c0_41] : memref<1x512xf32, #tpu.memory_space<vmem>>, vector<1x512xf32>
      tpu.vector_store %arg9[%c0_40, %c0_41], %75 {strides = array<i32>} : memref<1x512xf32, #tpu.memory_space<vmem>>, vector<1x512xf32>,
      %c0_42 = arith.constant 0 : index
      %c0_43 = arith.constant 0 : index
      %77 = vector.load %arg6[%c0_42, %c0_43] : memref<512x2xf32, #tpu.memory_space<vmem>>, vector<512x2xf32>
      %cst_44 = arith.constant dense<0.000000e+00> : vector<1x2xf32>
      %78 = tpu.matmul %75, %77, %cst_44 {dimension_numbers = #tpu.dot_dimension_numbers<[1], [0], [0], [1], [0, 0, 1, 1], [], []>} : vector<1x512xf32>, vector<512x2xf32>, vector<1x2xf32> -> vector<1x2xf32>
      %c0_45 = arith.constant 0 : index
      %c0_46 = arith.constant 0 : index
      %79 = vector.load %arg7[%c0_45, %c0_46] : memref<1x2xf32, #tpu.memory_space<vmem>>, vector<1x2xf32>
      tpu.vector_store %arg7[%c0_45, %c0_46], %78 {strides = array<i32>} : memref<1x2xf32, #tpu.memory_space<vmem>>, vector<1x2xf32>,
    } else {
    }
    return
  }
  func.func @transform_0(%arg0: i32) -> (i32, i32) {
    %c0_i32 = arith.constant 0 : i32
    %c0_i32_0 = arith.constant 0 : i32
    return %arg0, %c0_i32 : i32, i32
  }
  func.func @transform_1(%arg0: i32) -> (i32, i32) {
    %c0_i32 = arith.constant 0 : i32
    %c0_i32_0 = arith.constant 0 : i32
    %c0_i32_1 = arith.constant 0 : i32
    return %c0_i32, %c0_i32_0 : i32, i32
  }
  func.func @transform_2(%arg0: i32) -> (i32, i32) {
    %c0_i32 = arith.constant 0 : i32
    %c0_i32_0 = arith.constant 0 : i32
    %c0_i32_1 = arith.constant 0 : i32
    return %c0_i32, %c0_i32_0 : i32, i32
  }
  func.func @transform_3(%arg0: i32) -> (i32, i32) {
    %c0_i32 = arith.constant 0 : i32
    %c0_i32_0 = arith.constant 0 : i32
    %c0_i32_1 = arith.constant 0 : i32
    return %c0_i32, %c0_i32_0 : i32, i32
  }
  func.func @transform_4(%arg0: i32) -> (i32, i32) {
    %c0_i32 = arith.constant 0 : i32
    %c0_i32_0 = arith.constant 0 : i32
    %c0_i32_1 = arith.constant 0 : i32
    return %c0_i32, %c0_i32_0 : i32, i32
  }
  func.func @transform_5(%arg0: i32) -> (i32, i32) {
    %c0_i32 = arith.constant 0 : i32
    %c0_i32_0 = arith.constant 0 : i32
    %c0_i32_1 = arith.constant 0 : i32
    return %c0_i32, %c0_i32_0 : i32, i32
  }
  func.func @transform_6(%arg0: i32) -> (i32, i32) {
    %c0_i32 = arith.constant 0 : i32
    %c0_i32_0 = arith.constant 0 : i32
    %c0_i32_1 = arith.constant 0 : i32
    return %c0_i32, %c0_i32_0 : i32, i32
  }
  func.func @transform_7(%arg0: i32) -> (i32, i32) {
    %c0_i32 = arith.constant 0 : i32
    %c0_i32_0 = arith.constant 0 : i32
    return %arg0, %c0_i32 : i32, i32
  }
  func.func @transform_8(%arg0: i32) -> (i32, i32) {
    %c0_i32 = arith.constant 0 : i32
    %c0_i32_0 = arith.constant 0 : i32
    %c0_i32_1 = arith.constant 0 : i32
    return %c0_i32, %c0_i32_0 : i32, i32
  }
}

</mosaic_0001>

<bundles_post_ra>
// kernel: tpu_custom_call.1
= control target key start
LH: loop header
LB: loop body
LE: loop exit
PB: predicated region body
PF: predicated region fallthrough
CT: control target
= control target key end

     0   :  { %14 = vsyncpa [#allocation6], 0  ;;  %s3278_s0 = inlined_call_operand.vmem [shape: bf16[8,512], index: 0, kind: input, shape index: {}]   ;;  %s3279_s1 = inlined_call_operand.hbm [shape: bf16[512,512], index: 1, kind: input, shape index: {}]   ;;  %s3280_s2 = inlined_call_operand.hbm [shape: f32[1,512], index: 2, kind: input, shape index: {}]   ;;  %s3281_s3 = inlined_call_operand.vmem [shape: bf16[512,256], index: 3, kind: input, shape index: {}]   ;;  %s3282_s4 = inlined_call_operand.vmem [shape: f32[1,128], index: 4, kind: input, shape index: {}]   ;;  %s3283_s5 = inlined_call_operand.vmem [shape: f32[512,2], index: 5, kind: input, shape index: {}]   ;;  %s3284_s6 = inlined_call_operand.hbm [shape: f32[1,2], index: 6, kind: output, shape index: {0}]   ;;  %s3285_s7 = inlined_call_operand.vmem [shape: f32[8,1], index: 7, kind: output, shape index: {1}]   ;;  %s3286_s8 = inlined_call_operand.hbm [shape: f32[1,512], index: 8, kind: output, shape index: {2}]  }
   0x1   :  { %15 = vsyncpa [#allocation9], 0 }
   0x2   :  { %16 = vsyncpa [#allocation7], 0 }
   0x3   :  { %17 = vsyncpa [#allocation12], 0  ;;  %s2693_s27 = smov [#allocation5]   ;;  %s2597_s9 = scalar_lea.hbm %s3279_s1, 16384 }
   0x4   :  { %s25_s28 = sshll.u32 %s2693_s27, 4  ;;  %p2598_p0 = scmp.ne.s32.totalorder %s3279_s1, %s2597_s9  ;;  %s26_s28 = int_to_ptr.vmem [resolvable:$true] %s25_s28 }
   0x5   :  { %p2601_p1 = scmp.lt.u32.totalorder %s2597_s9, %s3279_s1 }
   0x7   :  { %p2603_p2 = pnand %p2601_p1, %p2598_p0 }
   0x9   :  { %2606 = shalt.err (!%p2603_p2)
}
   0xa   :  { %s2607_s14 = scalar_lea.vmem %s26_s28, 16384  ;;  %p2612_p4 = scmp.lt.s32.totalorder %s26_s28, %s26_s28 }
   0xb   :  { %p2608_p3 = scmp.ne.s32.totalorder %s26_s28, %s2607_s14  ;;  %p2613_p5 = scmp.lt.s32.totalorder %s2607_s14, %s2607_s14 }
   0xd   :  { %p2614_p6 = por %p2613_p5, %p2612_p4 }
   0xf   :  { %p2615_p7 = pnand %p2614_p6, %p2608_p3 }
  0x11   :  { %2618 = shalt.err (!%p2615_p7)
}
  0x12   :  { %s2694_s15 = smov 256   ;;  %s2695_s16 = smov 16  }
  0x13   :  { %31 = dma.hbm_to_vmem [thread:$0]  %s3279_s1, 16384, %s26_s28, [#allocation6], %s2694_s15, %s2694_s15, %s2695_s16  }
  0x14   :  { %s2696_s19 = smov [#allocation8]   ;;  %s2619_s23 = scalar_lea.hbm %s3280_s2, 64 }
  0x15   :  { %s38_s20 = sshll.u32 %s2696_s19, 4  ;;  %p2620_p8 = scmp.ne.s32.totalorder %s3280_s2, %s2619_s23  ;;  %s39_s20 = int_to_ptr.vmem [resolvable:$true] %s38_s20 }
  0x16   :  { %p2623_p9 = scmp.lt.u32.totalorder %s2619_s23, %s3280_s2 }
  0x18   :  { %p2625_p10 = pnand %p2623_p9, %p2620_p8 }
  0x1a   :  { %2628 = shalt.err (!%p2625_p10)
}
  0x1b   :  { %s2629_s29 = scalar_lea.vmem %s39_s20, 64  ;;  %p2634_p12 = scmp.lt.s32.totalorder %s39_s20, %s39_s20 }
  0x1c   :  { %p2630_p11 = scmp.ne.s32.totalorder %s39_s20, %s2629_s29  ;;  %p2635_p13 = scmp.lt.s32.totalorder %s2629_s29, %s2629_s29 }
  0x1e   :  { %p2636_p0 = por %p2635_p13, %p2634_p12 }
  0x20   :  { %p2637_p1 = pnand %p2636_p0, %p2630_p11 }
  0x22   :  { %2640 = shalt.err (!%p2637_p1)
}
  0x23   :  { %41 = dma.hbm_to_vmem [thread:$0]  %s3280_s2, 64, %s39_s20, [#allocation9]  }
  0x24   :  { %2685 = dma.done.wait [#allocation6], 16384  }
  0x25   :  { %2686 = vsyncadd [#allocation6], 4294950912 }
  0x26   :  { %2687 = dma.done.wait [#allocation9], 64  }
  0x27   :  { %2688 = vsyncadd [#allocation9], 4294967232  ;;  %v2295_v0 = vld [vmem:[#allocation5 + $0x4] ss:$16 sps:$4 sm:$0xff]   ;;  %v2297_v1 = vld [vmem:[#allocation5] ss:$16 sps:$4 sm:$0xff]  }
  0x28   :  { %872 = vmatprep.subr.bf16.mxu1 %v2295_v0  ;;  %v2298_v2 = vld [vmem:[#allocation5 + $0x204] ss:$16 sps:$4 sm:$0xff]   ;;  %v2300_v3 = vld [vmem:[#allocation5 + $0x200] ss:$16 sps:$4 sm:$0xff]   ;;  %vm58_vm0 = vcmask 0   ;;  %vm1527_vm1 = vcmask 7168  }
  0x29   :  { %873 = vmatpush1.bf16.msra.mxu1 %v2297_v1  ;;  %v2301_v4 = vld [vmem:[#allocation5 + $0x24] ss:$16 sps:$4 sm:$0xff]   ;;  %v2303_v5 = vld [vmem:[#allocation5 + $0x20] ss:$16 sps:$4 sm:$0xff]   ;;  %913 = vmatprep.subr.bf16.mxu0 %v2298_v2 }
  0x2a   :  { %v2304_v6 = vld [vmem:[#allocation5 + $0x224] ss:$16 sps:$4 sm:$0xff]   ;;  %914 = vmatpush1.bf16.msra.mxu0 %v2300_v3  ;;  %874 = vmatprep.subr.bf16.mxu1 %v2301_v4  ;;  %v2306_v7 = vld [vmem:[#allocation5 + $0x220] ss:$16 sps:$4 sm:$0xff]   ;;  %v2395_v3 = vld [vmem:[#allocation5 + $0xc] ss:$16 sps:$4 sm:$0xff]  }
  0x2b   :  { %915 = vmatprep.subr.bf16.mxu0 %v2304_v6  ;;  %v2307_v8 = vld [vmem:[#allocation5 + $0x44] ss:$16 sps:$4 sm:$0xff]   ;;  %v2309_v9 = vld [vmem:[#allocation5 + $0x40] ss:$16 sps:$4 sm:$0xff]   ;;  %v2393_v6 = vld [vmem:[#allocation5 + $0x8] ss:$16 sps:$4 sm:$0xff]  }
  0x2c   :  { %v2310_v10 = vld [vmem:[#allocation5 + $0x244] ss:$16 sps:$4 sm:$0xff]   ;;  %v2312_v12 = vld [vmem:[#allocation5 + $0x240] ss:$16 sps:$4 sm:$0xff]  }
  0x2d   :  { %875 = vmatpush1.bf16.msra.mxu1 %v2303_v5  ;;  %v2313_v11 = vld [vmem:[#allocation5 + $0x64] ss:$16 sps:$4 sm:$0xff]   ;;  %v2315_v14 = vld [vmem:[#allocation5 + $0x60] ss:$16 sps:$4 sm:$0xff]  }
  0x2e   :  { %876 = vmatprep.subr.bf16.mxu1 %v2307_v8  ;;  %916 = vmatpush1.bf16.msra.mxu0 %v2306_v7  ;;  %v2316_v13 = vld [vmem:[#allocation5 + $0x264] ss:$16 sps:$4 sm:$0xff]   ;;  %v2318_v16 = vld [vmem:[#allocation5 + $0x260] ss:$16 sps:$4 sm:$0xff]   ;;  %v2400_v8 = vld [vmem:[#allocation5 + $0x2c] ss:$16 sps:$4 sm:$0xff]  }
  0x2f   :  { %917 = vmatprep.subr.bf16.mxu0 %v2310_v10  ;;  %v2319_v15 = vld [vmem:[#allocation5 + $0x84] ss:$16 sps:$4 sm:$0xff]   ;;  %v2321_v18 = vld [vmem:[#allocation5 + $0x80] ss:$16 sps:$4 sm:$0xff]   ;;  %v2403_v10 = vld [vmem:[#allocation5 + $0x4c] ss:$16 sps:$4 sm:$0xff]  }
  0x30   :  { %v2322_v17 = vld [vmem:[#allocation5 + $0x284] ss:$16 sps:$4 sm:$0xff]   ;;  %v2324_v20 = vld [vmem:[#allocation5 + $0x280] ss:$16 sps:$4 sm:$0xff]  }
  0x31   :  { %877 = vmatpush1.bf16.msra.mxu1 %v2309_v9  ;;  %v2325_v19 = vld [vmem:[#allocation5 + $0xa4] ss:$16 sps:$4 sm:$0xff]   ;;  %v2327_v22 = vld [vmem:[#allocation5 + $0xa0] ss:$16 sps:$4 sm:$0xff]   ;;  %v2398_v9 = vld [vmem:[#allocation5 + $0x28] ss:$16 sps:$4 sm:$0xff]  }
  0x32   :  { %878 = vmatprep.subr.bf16.mxu1 %v2313_v11  ;;  %918 = vmatpush1.bf16.msra.mxu0 %v2312_v12  ;;  %v2328_v21 = vld [vmem:[#allocation5 + $0x2a4] ss:$16 sps:$4 sm:$0xff]   ;;  %v2330_v24 = vld [vmem:[#allocation5 + $0x2a0] ss:$16 sps:$4 sm:$0xff]   ;;  %v2401_v11 = vld [vmem:[#allocation5 + $0x48] ss:$16 sps:$4 sm:$0xff]  }
  0x33   :  { %919 = vmatprep.subr.bf16.mxu0 %v2316_v13  ;;  %v2331_v23 = vld [vmem:[#allocation5 + $0xc4] ss:$16 sps:$4 sm:$0xff]   ;;  %v2333_v26 = vld [vmem:[#allocation5 + $0xc0] ss:$16 sps:$4 sm:$0xff]   ;;  %v2406_v12 = vld [vmem:[#allocation5 + $0x6c] ss:$16 sps:$4 sm:$0xff]  }
  0x34   :  { %v2334_v25 = vld [vmem:[#allocation5 + $0x2c4] ss:$16 sps:$4 sm:$0xff]   ;;  %v2336_v28 = vld [vmem:[#allocation5 + $0x2c0] ss:$16 sps:$4 sm:$0xff]   ;;  %v2404_v13 = vld [vmem:[#allocation5 + $0x68] ss:$16 sps:$4 sm:$0xff]  }
  0x35   :  { %879 = vmatpush1.bf16.msra.mxu1 %v2315_v14  ;;  %v2337_v27 = vld [vmem:[#allocation5 + $0xe4] ss:$16 sps:$4 sm:$0xff]   ;;  %v2339_v30 = vld [vmem:[#allocation5 + $0xe0] ss:$16 sps:$4 sm:$0xff]   ;;  %v2409_v14 = vld [vmem:[#allocation5 + $0x8c] ss:$16 sps:$4 sm:$0xff]  }
  0x36   :  { %880 = vmatprep.subr.bf16.mxu1 %v2319_v15  ;;  %920 = vmatpush1.bf16.msra.mxu0 %v2318_v16  ;;  %v2340_v29 = vld [vmem:[#allocation5 + $0x2e4] ss:$16 sps:$4 sm:$0xff]   ;;  %v2342_v32 = vld [vmem:[#allocation5 + $0x2e0] ss:$16 sps:$4 sm:$0xff]   ;;  %v2407_v15 = vld [vmem:[#allocation5 + $0x88] ss:$16 sps:$4 sm:$0xff]  }
  0x37   :  { %921 = vmatprep.subr.bf16.mxu0 %v2322_v17  ;;  %v2343_v31 = vld [vmem:[#allocation5 + $0x104] ss:$16 sps:$4 sm:$0xff]   ;;  %v2345_v34 = vld [vmem:[#allocation5 + $0x100] ss:$16 sps:$4 sm:$0xff]   ;;  %v2412_v16 = vld [vmem:[#allocation5 + $0xac] ss:$16 sps:$4 sm:$0xff]  }
  0x38   :  { %v2346_v33 = vld [vmem:[#allocation5 + $0x304] ss:$16 sps:$4 sm:$0xff]   ;;  %v2348_v36 = vld [vmem:[#allocation5 + $0x300] ss:$16 sps:$4 sm:$0xff]   ;;  %v2410_v17 = vld [vmem:[#allocation5 + $0xa8] ss:$16 sps:$4 sm:$0xff]  }
  0x39   :  { %881 = vmatpush1.bf16.msra.mxu1 %v2321_v18  ;;  %v2349_v35 = vld [vmem:[#allocation5 + $0x124] ss:$16 sps:$4 sm:$0xff]   ;;  %v2351_v38 = vld [vmem:[#allocation5 + $0x120] ss:$16 sps:$4 sm:$0xff]   ;;  %v2415_v18 = vld [vmem:[#allocation5 + $0xcc] ss:$16 sps:$4 sm:$0xff]  }
  0x3a   :  { %882 = vmatprep.subr.bf16.mxu1 %v2325_v19  ;;  %922 = vmatpush1.bf16.msra.mxu0 %v2324_v20  ;;  %v2352_v37 = vld [vmem:[#allocation5 + $0x324] ss:$16 sps:$4 sm:$0xff]   ;;  %v2354_v40 = vld [vmem:[#allocation5 + $0x320] ss:$16 sps:$4 sm:$0xff]   ;;  %v2413_v19 = vld [vmem:[#allocation5 + $0xc8] ss:$16 sps:$4 sm:$0xff]  }
  0x3b   :  { %923 = vmatprep.subr.bf16.mxu0 %v2328_v21  ;;  %v2355_v39 = vld [vmem:[#allocation5 + $0x144] ss:$16 sps:$4 sm:$0xff]   ;;  %v2357_v42 = vld [vmem:[#allocation5 + $0x140] ss:$16 sps:$4 sm:$0xff]  }
  0x3c   :  { %v2358_v41 = vld [vmem:[#allocation5 + $0x344] ss:$16 sps:$4 sm:$0xff]   ;;  %v2360_v44 = vld [vmem:[#allocation5 + $0x340] ss:$16 sps:$4 sm:$0xff]  }
  0x3d   :  { %883 = vmatpush1.bf16.msra.mxu1 %v2327_v22  ;;  %v2361_v43 = vld [vmem:[#allocation5 + $0x164] ss:$16 sps:$4 sm:$0xff]   ;;  %v66_v46 = vld [vmem:[%s3278_s0] sm:$0xff] }
  0x3e   :  { %884 = vmatprep.subr.bf16.mxu1 %v2331_v23  ;;  %924 = vmatpush1.bf16.msra.mxu0 %v2330_v24  ;;  %v2364_v45 = vld [vmem:[#allocation5 + $0x364] ss:$16 sps:$4 sm:$0xff]   ;;  %v2363_v47 = vld [vmem:[#allocation5 + $0x160] ss:$16 sps:$4 sm:$0xff]   ;;  %v1934_v48 = vcombine.high %v66_v46, %v66_v46  ;;  %v2781_v5 = vcombine.low %v66_v46, %v66_v46  ;;  %v2418_v22 = vld [vmem:[#allocation5 + $0xec] ss:$16 sps:$4 sm:$0xff]  }
  0x3f   :  { %925 = vmatprep.subr.bf16.mxu0 %v2334_v25  ;;  %v2367_v49 = vld [vmem:[#allocation5 + $0x184] ss:$16 sps:$4 sm:$0xff]   ;;  %v2366_v51 = vld [vmem:[#allocation5 + $0x360] ss:$16 sps:$4 sm:$0xff]   ;;  %v2416_v24 = vld [vmem:[#allocation5 + $0xe8] ss:$16 sps:$4 sm:$0xff]  }
  0x40   :  { %v67_v50 = vld [vmem:[%s3278_s0 + $0x8] sm:$0xff]  ;;  %904 = vmatprep.mubr.bf16.mxu1 %v1934_v48  ;;  %v2496_v23 = vld [vmem:[%s3281_s3 + $0x14] ss:$8 sps:$4 sm:$0xff]   ;;  %v2494_v25 = vld [vmem:[%s3281_s3 + $0x10] ss:$8 sps:$4 sm:$0xff]  }
  0x41   :  { %885 = vmatpush1.bf16.msra.mxu1 %v2333_v26  ;;  %v2778_v52 = vcombine.high %v67_v50, %v67_v50  ;;  %v2370_v53 = vld [vmem:[#allocation5 + $0x384] ss:$16 sps:$4 sm:$0xff]   ;;  %v2369_v54 = vld [vmem:[#allocation5 + $0x180] ss:$16 sps:$4 sm:$0xff]   ;;  %v2783_v7 = vcombine.low %v67_v50, %v67_v50 }
  0x42   :  { %886 = vmatprep.subr.bf16.mxu1 %v2337_v27  ;;  %926 = vmatpush1.bf16.msra.mxu0 %v2336_v28  ;;  %v2373_v55 = vld [vmem:[#allocation5 + $0x1a4] ss:$16 sps:$4 sm:$0xff]   ;;  %v2372_v56 = vld [vmem:[#allocation5 + $0x380] ss:$16 sps:$4 sm:$0xff]   ;;  %v2421_v27 = vld [vmem:[#allocation5 + $0x10c] ss:$16 sps:$4 sm:$0xff]  }
  0x43   :  { %927 = vmatprep.subr.bf16.mxu0 %v2340_v29  ;;  %945 = vmatprep.mubr.bf16.mxu0 %v2778_v52  ;;  %v2376_v57 = vld [vmem:[#allocation5 + $0x3a4] ss:$16 sps:$4 sm:$0xff]   ;;  %v2375_v58 = vld [vmem:[#allocation5 + $0x1a0] ss:$16 sps:$4 sm:$0xff]   ;;  %v2419_v28 = vld [vmem:[#allocation5 + $0x108] ss:$16 sps:$4 sm:$0xff]  }
  0x44   :  { %v2379_v59 = vld [vmem:[#allocation5 + $0x1c4] ss:$16 sps:$4 sm:$0xff]   ;;  %v2378_v60 = vld [vmem:[#allocation5 + $0x3a0] ss:$16 sps:$4 sm:$0xff]  }
  0x45   :  { %887 = vmatpush1.bf16.msra.mxu1 %v2339_v30  ;;  %v2382_v61 = vld [vmem:[#allocation5 + $0x3c4] ss:$16 sps:$4 sm:$0xff]   ;;  %v2381_v62 = vld [vmem:[#allocation5 + $0x1c0] ss:$16 sps:$4 sm:$0xff]  }
  0x46   :  { %888 = vmatprep.subr.bf16.mxu1 %v2343_v31  ;;  %928 = vmatpush1.bf16.msra.mxu0 %v2342_v32  ;;  %v2385_v63 = vld [vmem:[#allocation5 + $0x1e4] ss:$16 sps:$4 sm:$0xff]   ;;  %v2384_v0 = vld [vmem:[#allocation5 + $0x3c0] ss:$16 sps:$4 sm:$0xff]   ;;  %v2424_v31 = vld [vmem:[#allocation5 + $0x12c] ss:$16 sps:$4 sm:$0xff]  }
  0x47   :  { %929 = vmatprep.subr.bf16.mxu0 %v2346_v33  ;;  %v2388_v1 = vld [vmem:[#allocation5 + $0x3e4] ss:$16 sps:$4 sm:$0xff]   ;;  %v2387_v2 = vld [vmem:[#allocation5 + $0x1e0] ss:$16 sps:$4 sm:$0xff]   ;;  %v2422_v32 = vld [vmem:[#allocation5 + $0x128] ss:$16 sps:$4 sm:$0xff]  }
  0x48   :  { %v2392_v4 = vld [vmem:[#allocation5 + $0x3e0] ss:$16 sps:$4 sm:$0xff]  }
  0x49   :  { %889 = vmatpush1.bf16.msra.mxu1 %v2345_v34  ;;  %v2491_v20 = vld [vmem:[%s3281_s3] ss:$8 sps:$4 sm:$0xff]   ;;  %v2493_v21 = vld [vmem:[%s3281_s3 + $0x4] ss:$8 sps:$4 sm:$0xff]   ;;  %v2502_v30 = vld [vmem:[%s3281_s3 + $0x34] ss:$8 sps:$4 sm:$0xff]  }
  0x4a   :  { %890 = vmatprep.subr.bf16.mxu1 %v2349_v35  ;;  %930 = vmatpush1.bf16.msra.mxu0 %v2348_v36  ;;  %v2499_v26 = vld [vmem:[%s3281_s3 + $0x24] ss:$8 sps:$4 sm:$0xff]   ;;  %v2497_v29 = vld [vmem:[%s3281_s3 + $0x20] ss:$8 sps:$4 sm:$0xff]   ;;  %v2500_v33 = vld [vmem:[%s3281_s3 + $0x30] ss:$8 sps:$4 sm:$0xff]  }
  0x4b   :  { %931 = vmatprep.subr.bf16.mxu0 %v2352_v37  ;;  %v2505_v34 = vld [vmem:[%s3281_s3 + $0x44] ss:$8 sps:$4 sm:$0xff]   ;;  %v2503_v37 = vld [vmem:[%s3281_s3 + $0x40] ss:$8 sps:$4 sm:$0xff]   ;;  %v2514_v46 = vld [vmem:[%s3281_s3 + $0x74] ss:$8 sps:$4 sm:$0xff]  }
  0x4c   :  { %v2427_v35 = vld [vmem:[#allocation5 + $0x14c] ss:$16 sps:$4 sm:$0xff]   ;;  %v2425_v36 = vld [vmem:[#allocation5 + $0x148] ss:$16 sps:$4 sm:$0xff]  }
  0x4d   :  { %891 = vmatpush1.bf16.msra.mxu1 %v2351_v38  ;;  %v2508_v38 = vld [vmem:[%s3281_s3 + $0x54] ss:$8 sps:$4 sm:$0xff]   ;;  %v2517_v50 = vld [vmem:[%s3281_s3 + $0x84] ss:$8 sps:$4 sm:$0xff]  }
  0x4e   :  { %892 = vmatprep.subr.bf16.mxu1 %v2355_v39  ;;  %932 = vmatpush1.bf16.msra.mxu0 %v2354_v40  ;;  %v2430_v39 = vld [vmem:[#allocation5 + $0x16c] ss:$16 sps:$4 sm:$0xff]  }
  0x4f   :  { %933 = vmatprep.subr.bf16.mxu0 %v2358_v41  ;;  %v2506_v40 = vld [vmem:[%s3281_s3 + $0x50] ss:$8 sps:$4 sm:$0xff]  }
  0x50   :  { %v2428_v41 = vld [vmem:[#allocation5 + $0x168] ss:$16 sps:$4 sm:$0xff]  }
  0x51   :  { %893 = vmatpush1.bf16.msra.mxu1 %v2357_v42  ;;  %v2511_v42 = vld [vmem:[%s3281_s3 + $0x64] ss:$8 sps:$4 sm:$0xff]  }
  0x52   :  { %894 = vmatprep.subr.bf16.mxu1 %v2361_v43  ;;  %934 = vmatpush1.bf16.msra.mxu0 %v2360_v44  ;;  %v2433_v43 = vld [vmem:[#allocation5 + $0x18c] ss:$16 sps:$4 sm:$0xff]  }
  0x53   :  { %935 = vmatprep.subr.bf16.mxu0 %v2364_v45  ;;  %v2509_v44 = vld [vmem:[%s3281_s3 + $0x60] ss:$8 sps:$4 sm:$0xff]  }
  0x54   :  { %v2431_v45 = vld [vmem:[#allocation5 + $0x188] ss:$16 sps:$4 sm:$0xff]  }
  0x55   :  { %895 = vmatpush1.bf16.msra.mxu1 %v2363_v47  ;;  %v2436_v47 = vld [vmem:[#allocation5 + $0x1ac] ss:$16 sps:$4 sm:$0xff]  }
  0x56   :  { %896 = vmatprep.subr.bf16.mxu1 %v2367_v49  ;;  %936 = vmatpush1.bf16.msra.mxu0 %v2366_v51  ;;  %v2434_v49 = vld [vmem:[#allocation5 + $0x1a8] ss:$16 sps:$4 sm:$0xff]   ;;  %v2439_v51 = vld [vmem:[#allocation5 + $0x1cc] ss:$16 sps:$4 sm:$0xff]  }
  0x57   :  { %937 = vmatprep.subr.bf16.mxu0 %v2370_v53  ;;  %v2515_v53 = vld [vmem:[%s3281_s3 + $0x80] ss:$8 sps:$4 sm:$0xff]  }
  0x59   :  { %897 = vmatpush1.bf16.msra.mxu1 %v2369_v54  ;;  %v2437_v54 = vld [vmem:[#allocation5 + $0x1c8] ss:$16 sps:$4 sm:$0xff]  }
  0x5a   :  { %898 = vmatprep.subr.bf16.mxu1 %v2373_v55  ;;  %938 = vmatpush1.bf16.msra.mxu0 %v2372_v56  ;;  %v2520_v55 = vld [vmem:[%s3281_s3 + $0x94] ss:$8 sps:$4 sm:$0xff]  }
  0x5b   :  { %939 = vmatprep.subr.bf16.mxu0 %v2376_v57  ;;  %v2442_v56 = vld [vmem:[#allocation5 + $0x1ec] ss:$16 sps:$4 sm:$0xff]  }
  0x5c   :  { %v2518_v57 = vld [vmem:[%s3281_s3 + $0x90] ss:$8 sps:$4 sm:$0xff]  }
  0x5d   :  { %899 = vmatpush1.bf16.msra.mxu1 %v2375_v58  ;;  %v2440_v58 = vld [vmem:[#allocation5 + $0x1e8] ss:$16 sps:$4 sm:$0xff]  }
  0x5e   :  { %900 = vmatprep.subr.bf16.mxu1 %v2379_v59  ;;  %940 = vmatpush1.bf16.msra.mxu0 %v2378_v60  ;;  %v2523_v59 = vld [vmem:[%s3281_s3 + $0xa4] ss:$8 sps:$4 sm:$0xff]  }
  0x5f   :  { %941 = vmatprep.subr.bf16.mxu0 %v2382_v61  ;;  %v2445_v60 = vld [vmem:[#allocation5 + $0x20c] ss:$16 sps:$4 sm:$0xff]  }
  0x60   :  { %v2521_v61 = vld [vmem:[%s3281_s3 + $0xa0] ss:$8 sps:$4 sm:$0xff]  }
  0x61   :  { %901 = vmatpush1.bf16.msra.mxu1 %v2381_v62  ;;  %v2443_v62 = vld [vmem:[#allocation5 + $0x208] ss:$16 sps:$4 sm:$0xff]  }
  0x62   :  { %902 = vmatprep.subr.bf16.mxu1 %v2385_v63  ;;  %942 = vmatpush1.bf16.msra.mxu0 %v2384_v0  ;;  %v2448_v63 = vld [vmem:[#allocation5 + $0x22c] ss:$16 sps:$4 sm:$0xff]  }
  0x63   :  { %943 = vmatprep.subr.bf16.mxu0 %v2388_v1  ;;  %v2526_v0 = vld [vmem:[%s3281_s3 + $0xb4] ss:$8 sps:$4 sm:$0xff]   ;;  %v2524_v1 = vld [vmem:[%s3281_s3 + $0xb0] ss:$8 sps:$4 sm:$0xff]  }
  0x65   :  { %903 = vmatpush1.bf16.msra.mxu1 %v2387_v2  ;;  %v2446_v2 = vld [vmem:[#allocation5 + $0x228] ss:$16 sps:$4 sm:$0xff]  }
  0x66   :  { %954 = vmatprep.subr.bf16.mxu1 %v2395_v3  ;;  %944 = vmatpush1.bf16.msra.mxu0 %v2392_v4  ;;  %v2529_v3 = vld [vmem:[%s3281_s3 + $0xc4] ss:$8 sps:$4 sm:$0xff]  }
  0x67   :  { %1428 = vmatprep.subr.bf16.mxu0 %v2493_v21  ;;  %v2451_v4 = vld [vmem:[#allocation5 + $0x24c] ss:$16 sps:$4 sm:$0xff]   ;;  %v2464_v21 = vld [vmem:[#allocation5 + $0x2e8] ss:$16 sps:$4 sm:$0xff]  }
  0x68   :  { %905 = vmatmul.mubr.bf16.vlgmr.msra.gmra.mrb[0].mxu1 %v2781_v5 }
  0x69   :  { %955 = vmatpush1.bf16.msra.mxu1 %v2393_v6  ;;  %986 = vmatprep.mubr.bf16.mxu1 %v1934_v48  ;;  %v2512_v48 = vld [vmem:[%s3281_s3 + $0x70] ss:$8 sps:$4 sm:$0xff]  }
  0x6a   :  { %946 = vmatmul.mubr.bf16.vlgmr.msra.gmra.mrb[0].mxu0 %v2783_v7  ;;  %956 = vmatprep.subr.bf16.mxu1 %v2400_v8  ;;  %v2449_v6 = vld [vmem:[#allocation5 + $0x248] ss:$16 sps:$4 sm:$0xff]  }
  0x6b   :  { %1429 = vmatpush1.bf16.msra.mxu0 %v2491_v20  ;;  %v2532_v8 = vld [vmem:[%s3281_s3 + $0xd4] ss:$8 sps:$4 sm:$0xff]  }
  0x6c   :  { %1430 = vmatprep.subr.bf16.mxu0 %v2496_v23  ;;  %v2538_v20 = vld [vmem:[%s3281_s3 + $0xf4] ss:$8 sps:$4 sm:$0xff]  }
  0x6d   :  { %957 = vmatpush1.bf16.msra.mxu1 %v2398_v9  ;;  %v2530_v9 = vld [vmem:[%s3281_s3 + $0xd0] ss:$8 sps:$4 sm:$0xff]  }
  0x6e   :  { %958 = vmatprep.subr.bf16.mxu1 %v2403_v10  ;;  %v2452_v10 = vld [vmem:[#allocation5 + $0x268] ss:$16 sps:$4 sm:$0xff]   ;;  %v2469_v23 = vld [vmem:[#allocation5 + $0x30c] ss:$16 sps:$4 sm:$0xff]  }
  0x6f   :  { %1431 = vmatpush1.bf16.msra.mxu0 %v2494_v25  ;;  %v2472_v25 = vld [vmem:[#allocation5 + $0x32c] ss:$16 sps:$4 sm:$0xff]  }
  0x70   :  { %1432 = vmatprep.subr.bf16.mxu0 %v2499_v26  ;;  %v2541_v26 = vld [vmem:[%s3281_s3 + $0x104] ss:$8 sps:$4 sm:$0xff]  }
  0x71   :  { %959 = vmatpush1.bf16.msra.mxu1 %v2401_v11  ;;  %v2457_v11 = vld [vmem:[#allocation5 + $0x28c] ss:$16 sps:$4 sm:$0xff]  }
  0x72   :  { %960 = vmatprep.subr.bf16.mxu1 %v2406_v12  ;;  %v2455_v12 = vld [vmem:[#allocation5 + $0x288] ss:$16 sps:$4 sm:$0xff]  }
  0x73   :  { %1433 = vmatpush1.bf16.msra.mxu0 %v2497_v29  ;;  %v2473_v29 = vld [vmem:[#allocation5 + $0x348] ss:$16 sps:$4 sm:$0xff]  }
  0x74   :  { %1434 = vmatprep.subr.bf16.mxu0 %v2502_v30  ;;  %v2478_v30 = vld [vmem:[#allocation5 + $0x36c] ss:$16 sps:$4 sm:$0xff]  }
  0x75   :  { %961 = vmatpush1.bf16.msra.mxu1 %v2404_v13  ;;  %v2460_v13 = vld [vmem:[#allocation5 + $0x2ac] ss:$16 sps:$4 sm:$0xff]  }
  0x76   :  { %962 = vmatprep.subr.bf16.mxu1 %v2409_v14  ;;  %v2458_v14 = vld [vmem:[#allocation5 + $0x2a8] ss:$16 sps:$4 sm:$0xff]  }
  0x77   :  { %1435 = vmatpush1.bf16.msra.mxu0 %v2500_v33  ;;  %v2479_v33 = vld [vmem:[#allocation5 + $0x388] ss:$16 sps:$4 sm:$0xff]  }
  0x78   :  { %1436 = vmatprep.subr.bf16.mxu0 %v2505_v34  ;;  %v2484_v34 = vld [vmem:[#allocation5 + $0x3ac] ss:$16 sps:$4 sm:$0xff]  }
  0x79   :  { %963 = vmatpush1.bf16.msra.mxu1 %v2407_v15  ;;  %v2463_v15 = vld [vmem:[#allocation5 + $0x2cc] ss:$16 sps:$4 sm:$0xff]  }
  0x7a   :  { %964 = vmatprep.subr.bf16.mxu1 %v2412_v16  ;;  %v2535_v16 = vld [vmem:[%s3281_s3 + $0xe4] ss:$8 sps:$4 sm:$0xff]  }
  0x7b   :  { %1437 = vmatpush1.bf16.msra.mxu0 %v2503_v37  ;;  %v2485_v37 = vld [vmem:[#allocation5 + $0x3c8] ss:$16 sps:$4 sm:$0xff]  }
  0x7c   :  { %1438 = vmatprep.subr.bf16.mxu0 %v2508_v38  ;;  %v2490_v38 = vld [vmem:[#allocation5 + $0x3ec] ss:$16 sps:$4 sm:$0xff]  }
  0x7d   :  { %965 = vmatpush1.bf16.msra.mxu1 %v2410_v17  ;;  %v2461_v17 = vld [vmem:[#allocation5 + $0x2c8] ss:$16 sps:$4 sm:$0xff]  }
  0x7e   :  { %966 = vmatprep.subr.bf16.mxu1 %v2415_v18  ;;  %v2533_v18 = vld [vmem:[%s3281_s3 + $0xe0] ss:$8 sps:$4 sm:$0xff]  }
  0x7f   :  { %1439 = vmatpush1.bf16.msra.mxu0 %v2506_v40  ;;  %v61_v40 = vlaneseq }
  0x80   :  { %1440 = vmatprep.subr.bf16.mxu0 %v2511_v42 }
  0x81   :  { %967 = vmatpush1.bf16.msra.mxu1 %v2413_v19  ;;  %v2466_v19 = vld [vmem:[#allocation5 + $0x2ec] ss:$16 sps:$4 sm:$0xff]   ;;  %vm3032_vm2 = vcmp.lt.s32.totalorder %v61_v40, 512 }
  0x82   :  { %968 = vmatprep.subr.bf16.mxu1 %v2418_v22  ;;  %v2536_v22 = vld [vmem:[%s3281_s3 + $0xf0] ss:$8 sps:$4 sm:$0xff]  }
  0x83   :  { %1441 = vmatpush1.bf16.msra.mxu0 %v2509_v44 }
  0x84   :  { %1442 = vmatprep.subr.bf16.mxu0 %v2514_v46 }
  0x85   :  { %969 = vmatpush1.bf16.msra.mxu1 %v2416_v24  ;;  %v2467_v24 = vld [vmem:[#allocation5 + $0x308] ss:$16 sps:$4 sm:$0xff]  }
  0x86   :  { %970 = vmatprep.subr.bf16.mxu1 %v2421_v27  ;;  %v2470_v27 = vld [vmem:[#allocation5 + $0x328] ss:$16 sps:$4 sm:$0xff]  }
  0x87   :  { %1443 = vmatpush1.bf16.msra.mxu0 %v2512_v48 }
  0x88   :  { %1444 = vmatprep.subr.bf16.mxu0 %v2517_v50 }
  0x89   :  { %971 = vmatpush1.bf16.msra.mxu1 %v2419_v28  ;;  %v2475_v28 = vld [vmem:[#allocation5 + $0x34c] ss:$16 sps:$4 sm:$0xff]  }
  0x8a   :  { %972 = vmatprep.subr.bf16.mxu1 %v2424_v31  ;;  %v2476_v31 = vld [vmem:[#allocation5 + $0x368] ss:$16 sps:$4 sm:$0xff]  }
  0x8b   :  { %1445 = vmatpush1.bf16.msra.mxu0 %v2515_v53 }
  0x8c   :  { %1446 = vmatprep.subr.bf16.mxu0 %v2520_v55 }
  0x8d   :  { %973 = vmatpush1.bf16.msra.mxu1 %v2422_v32  ;;  %v2481_v32 = vld [vmem:[#allocation5 + $0x38c] ss:$16 sps:$4 sm:$0xff]  }
  0x8e   :  { %974 = vmatprep.subr.bf16.mxu1 %v2427_v35  ;;  %v2482_v35 = vld [vmem:[#allocation5 + $0x3a8] ss:$16 sps:$4 sm:$0xff]  }
  0x8f   :  { %1447 = vmatpush1.bf16.msra.mxu0 %v2518_v57 }
  0x90   :  { %1448 = vmatprep.subr.bf16.mxu0 %v2523_v59 }
  0x91   :  { %975 = vmatpush1.bf16.msra.mxu1 %v2425_v36  ;;  %v2487_v36 = vld [vmem:[#allocation5 + $0x3cc] ss:$16 sps:$4 sm:$0xff]  }
  0x92   :  { %976 = vmatprep.subr.bf16.mxu1 %v2430_v39  ;;  %v2488_v39 = vld [vmem:[#allocation5 + $0x3e8] ss:$16 sps:$4 sm:$0xff]  }
  0x93   :  { %1449 = vmatpush1.bf16.msra.mxu0 %v2521_v61 }
  0x94   :  { %1450 = vmatprep.subr.bf16.mxu0 %v2526_v0  ;;  %v2544_v0 = vld [vmem:[%s3281_s3 + $0x114] ss:$8 sps:$4 sm:$0xff]  }
  0x95   :  { %977 = vmatpush1.bf16.msra.mxu1 %v2428_v41  ;;  %v2890_v41 = vshrl.u32 %v61_v40, 7  ;;  %v1689_v40 = vld [vmem:[%s3283_s5 + $0x88] sm:$0xff] }
  0x96   :  { %978 = vmatprep.subr.bf16.mxu1 %v2433_v43  ;;  %v2895_v43 = vld [vmem:[#allocation8] sm:$0xf] }
  0x97   :  { %1451 = vmatpush1.bf16.msra.mxu0 %v2524_v1  ;;  %v2893_v42 = vsub.s32 0, %v2890_v41  ;;  %v204_v44 = vsub.s32 1, %v2890_v41  ;;  %v2542_v1 = vld [vmem:[%s3281_s3 + $0x110] ss:$8 sps:$4 sm:$0xff]  }
  0x98   :  { %1452 = vmatprep.subr.bf16.mxu0 %v2529_v3  ;;  %v2545_v3 = vld [vmem:[%s3281_s3 + $0x120] ss:$8 sps:$4 sm:$0xff]  }
  0x99   :  { %979 = vmatpush1.bf16.msra.mxu1 %v2431_v45  ;;  %v201_v45 = vrot.slane %v2895_v43, %v2893_v42  ;;  %v205_v46 = vrot.slane %v2895_v43, %v204_v44 }
  0x9a   :  { %980 = vmatprep.subr.bf16.mxu1 %v2436_v47 }
  0x9d   :  { %981 = vmatpush1.bf16.msra.mxu1 %v2434_v49 }
  0x9e   :  { %982 = vmatprep.subr.bf16.mxu1 %v2439_v51 }
  0xa1   :  { %983 = vmatpush1.bf16.msra.mxu1 %v2437_v54 }
  0xa2   :  { %984 = vmatprep.subr.bf16.mxu1 %v2442_v56 }
  0xa5   :  { %985 = vmatpush1.bf16.msra.mxu1 %v2440_v58 }
  0xa6   :  { %995 = vmatprep.subr.bf16.mxu1 %v2445_v60 }
  0xa8   :  { %987 = vmatmul.mubr.bf16.vlgmr.msra.gmra.mrb[4].mxu1 %v2781_v5  ;;  %v2527_v5 = vld [vmem:[%s3281_s3 + $0xc0] ss:$8 sps:$4 sm:$0xff]  }
  0xa9   :  { %996 = vmatpush1.bf16.msra.mxu1 %v2443_v62  ;;  %1027 = vmatprep.mubr.bf16.mxu1 %v2778_v52  ;;  %v2454_v52 = vld [vmem:[#allocation5 + $0x26c] ss:$16 sps:$4 sm:$0xff]  }
  0xaa   :  { %997 = vmatprep.subr.bf16.mxu1 %v2448_v63  ;;  %1453 = vmatpush1.bf16.msra.mxu0 %v2527_v5  ;;  %v2539_v63 = vld [vmem:[%s3281_s3 + $0x100] ss:$8 sps:$4 sm:$0xff]   ;;  %v2548_v5 = vld [vmem:[%s3281_s3 + $0x130] ss:$8 sps:$4 sm:$0xff]  }
  0xab   :  { %1454 = vmatprep.subr.bf16.mxu0 %v2532_v8  ;;  %v2551_v8 = vld [vmem:[%s3281_s3 + $0x140] ss:$8 sps:$4 sm:$0xff]  }
  0xad   :  { %998 = vmatpush1.bf16.msra.mxu1 %v2446_v2  ;;  %v2547_v2 = vld [vmem:[%s3281_s3 + $0x124] ss:$8 sps:$4 sm:$0xff]  }
  0xae   :  { %999 = vmatprep.subr.bf16.mxu1 %v2451_v4  ;;  %1455 = vmatpush1.bf16.msra.mxu0 %v2530_v9  ;;  %v2550_v4 = vld [vmem:[%s3281_s3 + $0x134] ss:$8 sps:$4 sm:$0xff]   ;;  %v2554_v9 = vld [vmem:[%s3281_s3 + $0x150] ss:$8 sps:$4 sm:$0xff]  }
  0xaf   :  { %1456 = vmatprep.subr.bf16.mxu0 %v2535_v16  ;;  %v2568_v16 = vld [vmem:[%s3281_s3 + $0x194] ss:$8 sps:$4 sm:$0xff]  }
  0xb1   :  { %1000 = vmatpush1.bf16.msra.mxu1 %v2449_v6  ;;  %v2553_v6 = vld [vmem:[%s3281_s3 + $0x144] ss:$8 sps:$4 sm:$0xff]  }
  0xb2   :  { %1001 = vmatprep.subr.bf16.mxu1 %v2454_v52  ;;  %1457 = vmatpush1.bf16.msra.mxu0 %v2533_v18  ;;  %v2556_v52 = vld [vmem:[%s3281_s3 + $0x154] ss:$8 sps:$4 sm:$0xff]   ;;  %v2571_v18 = vld [vmem:[%s3281_s3 + $0x1a4] ss:$8 sps:$4 sm:$0xff]  }
  0xb3   :  { %1458 = vmatprep.subr.bf16.mxu0 %v2538_v20  ;;  %v2574_v20 = vld [vmem:[%s3281_s3 + $0x1b4] ss:$8 sps:$4 sm:$0xff]  }
  0xb5   :  { %1002 = vmatpush1.bf16.msra.mxu1 %v2452_v10  ;;  %v2559_v10 = vld [vmem:[%s3281_s3 + $0x164] ss:$8 sps:$4 sm:$0xff]  }
  0xb6   :  { %1003 = vmatprep.subr.bf16.mxu1 %v2457_v11  ;;  %1459 = vmatpush1.bf16.msra.mxu0 %v2536_v22  ;;  %v2557_v11 = vld [vmem:[%s3281_s3 + $0x160] ss:$8 sps:$4 sm:$0xff]   ;;  %v2577_v22 = vld [vmem:[%s3281_s3 + $0x1c4] ss:$8 sps:$4 sm:$0xff]  }
  0xb7   :  { %1469 = vmatprep.subr.bf16.mxu0 %v2541_v26  ;;  %v2583_v26 = vld [vmem:[%s3281_s3 + $0x1e4] ss:$8 sps:$4 sm:$0xff]  }
  0xb9   :  { %1004 = vmatpush1.bf16.msra.mxu1 %v2455_v12  ;;  %v2562_v12 = vld [vmem:[%s3281_s3 + $0x174] ss:$8 sps:$4 sm:$0xff]  }
  0xba   :  { %1005 = vmatprep.subr.bf16.mxu1 %v2460_v13  ;;  %v2560_v13 = vld [vmem:[%s3281_s3 + $0x170] ss:$8 sps:$4 sm:$0xff]  }
  0xbd   :  { %1006 = vmatpush1.bf16.msra.mxu1 %v2458_v14  ;;  %v2565_v14 = vld [vmem:[%s3281_s3 + $0x184] ss:$8 sps:$4 sm:$0xff]  }
  0xbe   :  { %1007 = vmatprep.subr.bf16.mxu1 %v2463_v15  ;;  %v2563_v15 = vld [vmem:[%s3281_s3 + $0x180] ss:$8 sps:$4 sm:$0xff]  }
  0xc1   :  { %1008 = vmatpush1.bf16.msra.mxu1 %v2461_v17  ;;  %v2566_v17 = vld [vmem:[%s3281_s3 + $0x190] ss:$8 sps:$4 sm:$0xff]  }
  0xc2   :  { %1009 = vmatprep.subr.bf16.mxu1 %v2466_v19  ;;  %v2569_v19 = vld [vmem:[%s3281_s3 + $0x1a0] ss:$8 sps:$4 sm:$0xff]  }
  0xc5   :  { %1010 = vmatpush1.bf16.msra.mxu1 %v2464_v21  ;;  %v2572_v21 = vld [vmem:[%s3281_s3 + $0x1b0] ss:$8 sps:$4 sm:$0xff]  }
  0xc6   :  { %1011 = vmatprep.subr.bf16.mxu1 %v2469_v23  ;;  %v2575_v23 = vld [vmem:[%s3281_s3 + $0x1c0] ss:$8 sps:$4 sm:$0xff]  }
  0xc9   :  { %1012 = vmatpush1.bf16.msra.mxu1 %v2467_v24  ;;  %v2580_v24 = vld [vmem:[%s3281_s3 + $0x1d4] ss:$8 sps:$4 sm:$0xff]  }
  0xca   :  { %1013 = vmatprep.subr.bf16.mxu1 %v2472_v25  ;;  %v2578_v25 = vld [vmem:[%s3281_s3 + $0x1d0] ss:$8 sps:$4 sm:$0xff]  }
  0xcd   :  { %1014 = vmatpush1.bf16.msra.mxu1 %v2470_v27  ;;  %v2581_v27 = vld [vmem:[%s3281_s3 + $0x1e0] ss:$8 sps:$4 sm:$0xff]  }
  0xce   :  { %1015 = vmatprep.subr.bf16.mxu1 %v2475_v28  ;;  %v2586_v28 = vld [vmem:[%s3281_s3 + $0x1f4] ss:$8 sps:$4 sm:$0xff]  }
  0xd1   :  { %1016 = vmatpush1.bf16.msra.mxu1 %v2473_v29  ;;  %v2584_v29 = vld [vmem:[%s3281_s3 + $0x1f0] ss:$8 sps:$4 sm:$0xff]  }
  0xd2   :  { %1017 = vmatprep.subr.bf16.mxu1 %v2478_v30  ;;  %v208_v30 = vsub.s32 2, %v2890_v41 }
  0xd5   :  { %1018 = vmatpush1.bf16.msra.mxu1 %v2476_v31  ;;  %v212_v31 = vsub.s32 3, %v2890_v41 }
  0xd6   :  { %1019 = vmatprep.subr.bf16.mxu1 %v2481_v32  ;;  %v209_v32 = vrot.slane %v2895_v43, %v208_v30 }
  0xd9   :  { %1020 = vmatpush1.bf16.msra.mxu1 %v2479_v33  ;;  %v213_v33 = vrot.slane %v2895_v43, %v212_v31 }
  0xda   :  { %1021 = vmatprep.subr.bf16.mxu1 %v2484_v34 }
  0xdd   :  { %1022 = vmatpush1.bf16.msra.mxu1 %v2482_v35 }
  0xde   :  { %1023 = vmatprep.subr.bf16.mxu1 %v2487_v36 }
  0xe1   :  { %1024 = vmatpush1.bf16.msra.mxu1 %v2485_v37 }
  0xe2   :  { %1025 = vmatprep.subr.bf16.mxu1 %v2490_v38 }
  0xe5   :  { %1026 = vmatpush1.bf16.msra.mxu1 %v2488_v39 }
  0xe8   :  { %1028 = vmatmul.mubr.bf16.vlgmr.msra.gmra.mrb[4].mxu1 %v2783_v7 }
 0x13b   :  { %v906_v47 = vpop.f32.mrb[0].mxu1 }
 0x13c   :  { %v907_v7 = vadd.f32 %v906_v47, %v201_v45  ;;  %v908_v48 = vpop.f32.mrb[1].mxu1 }
 0x13d   :  { %v909_v49 = vadd.f32 %v908_v48, %v205_v46  ;;  %v910_v50 = vpop.f32.mrb[2].mxu1  ;;  %v947_v51 = vpop.f32.mrb[0].mxu0 }
 0x13e   :  { %v948_v53 = vadd.f32 %v947_v51, %v907_v7  ;;  %v911_v54 = vpop.f32.mrb[3].mxu1  ;;  %v949_v55 = vpop.f32.mrb[1].mxu0 }
 0x13f   :  { %v950_v56 = vadd.f32 %v949_v55, %v909_v49  ;;  %v951_v57 = vpop.f32.mrb[2].mxu0 }
 0x140   :  { %v2903_v58 = vmax.f32 %v948_v53, 0.0  ;;  %v952_v59 = vpop.f32.mrb[3].mxu0 }
 0x141   :  { %v2905_v60 = vmax.f32 %v950_v56, 0.0  ;;  %v2130_v56 = vld [vmem:[%s3282_s4] ss:$0 sm:$0xff] }
 0x142   :  { %v1040_v61 = vpack.c.bf16 %v2903_v58, %v2903_v58 }
 0x143   :  { %v1041_v62 = vpack.c.bf16 %v2905_v60, %v2905_v60 }
 0x145   :  { %1460 = vmatprep.mubr.bf16.mxu0 %v1041_v62  ;;  %v2698_v62 = vmov 0  }
 0x146   :  { %1461 = vmatmul.mubr.bf16.vlgmr.msra.gmra.mrb[4].mxu0 %v1040_v61  ;;  %v2697_v61 = vmov -1e+30   ;;  %2293 = vset.pattern.permute.xlu1 %v2698_v62 }
 0x147   :  { %1470 = vmatpush1.bf16.msra.mxu0 %v2539_v63  ;;  %59 = vst.msk [vmem:[#allocation2] sm:$0x1] %vm58_vm0, %v2697_v61  ;;  %v2699_v63 = vmov 0.0   ;;  %2294 = vset.pattern.permute.xlu0 %v2698_v62  ;;  %v1709_v61 = vld [vmem:[%s3283_s5 + $0x128] sm:$0xff] }
 0x148   :  { %1471 = vmatprep.subr.bf16.mxu0 %v2544_v0  ;;  %60 = vst.msk [vmem:[#allocation3] sm:$0x1] %vm58_vm0, %v2699_v63 }
 0x149   :  { %65 = vst.msk [vmem:[#allocation4] sm:$0xf] %vm3032_vm2, %v2699_v63  ;;  %v1694_v63 = vld [vmem:[%s3283_s5 + $0xb0] sm:$0xff] }
 0x14b   :  { %1472 = vmatpush1.bf16.msra.mxu0 %v2542_v1 }
 0x14c   :  { %1473 = vmatprep.subr.bf16.mxu0 %v2547_v2 }
 0x14f   :  { %1474 = vmatpush1.bf16.msra.mxu0 %v2545_v3 }
 0x150   :  { %1475 = vmatprep.subr.bf16.mxu0 %v2550_v4 }
 0x153   :  { %1476 = vmatpush1.bf16.msra.mxu0 %v2548_v5 }
 0x154   :  { %1477 = vmatprep.subr.bf16.mxu0 %v2553_v6 }
 0x157   :  { %1478 = vmatpush1.bf16.msra.mxu0 %v2551_v8  ;;  %v1536_v8 = vld [vmem:[#allocation2] sm:$0x1] }
 0x158   :  { %1479 = vmatprep.subr.bf16.mxu0 %v2556_v52 }
 0x15b   :  { %1480 = vmatpush1.bf16.msra.mxu0 %v2554_v9 }
 0x15c   :  { %1481 = vmatprep.subr.bf16.mxu0 %v2559_v10 }
 0x15f   :  { %1482 = vmatpush1.bf16.msra.mxu0 %v2557_v11 }
 0x160   :  { %1483 = vmatprep.subr.bf16.mxu0 %v2562_v12 }
 0x163   :  { %1484 = vmatpush1.bf16.msra.mxu0 %v2560_v13 }
 0x164   :  { %1485 = vmatprep.subr.bf16.mxu0 %v2565_v14 }
 0x167   :  { %1486 = vmatpush1.bf16.msra.mxu0 %v2563_v15 }
 0x168   :  { %1487 = vmatprep.subr.bf16.mxu0 %v2568_v16 }
 0x16b   :  { %1488 = vmatpush1.bf16.msra.mxu0 %v2566_v17 }
 0x16c   :  { %1489 = vmatprep.subr.bf16.mxu0 %v2571_v18 }
 0x16f   :  { %1490 = vmatpush1.bf16.msra.mxu0 %v2569_v19  ;;  %v1688_v19 = vld [vmem:[%s3283_s5 + $0x80] sm:$0xff] }
 0x170   :  { %1491 = vmatprep.subr.bf16.mxu0 %v2574_v20  ;;  %v1720_v20 = vld [vmem:[%s3283_s5 + $0x180] sm:$0xff] }
 0x173   :  { %1492 = vmatpush1.bf16.msra.mxu0 %v2572_v21  ;;  %v2201_v21 = vpack.c.bf16 %v1689_v40, %v1688_v19 }
 0x174   :  { %1493 = vmatprep.subr.bf16.mxu0 %v2577_v22  ;;  %v1721_v22 = vld [vmem:[%s3283_s5 + $0x188] sm:$0xff] }
 0x177   :  { %1494 = vmatpush1.bf16.msra.mxu0 %v2575_v23  ;;  %v1672_v23 = vld [vmem:[%s3283_s5] sm:$0xff] }
 0x178   :  { %1495 = vmatprep.subr.bf16.mxu0 %v2580_v24  ;;  %v1673_v24 = vld [vmem:[%s3283_s5 + $0x8] sm:$0xff] }
 0x17b   :  { %1496 = vmatpush1.bf16.msra.mxu0 %v2578_v25  ;;  %v2233_v25 = vpack.c.bf16 %v1721_v22, %v1720_v20  ;;  %v2700_v22 = vmov 1966171168  }
 0x17c   :  { %1497 = vmatprep.subr.bf16.mxu0 %v2583_v26  ;;  %v2203_v26 = vpack.c.bf16 %v1673_v24, %v1672_v23  ;;  %v1626_v23 = vunpack.c.l.s4 %v2700_v22 }
 0x17d   :  { %2234 = vmatprep.subr.bf16.mxu1 %v2233_v25 }
 0x17f   :  { %1498 = vmatpush1.bf16.msra.mxu0 %v2581_v27  ;;  %v1704_v27 = vld [vmem:[%s3283_s5 + $0x100] sm:$0xff] }
 0x180   :  { %1499 = vmatprep.subr.bf16.mxu0 %v2586_v28  ;;  %v1705_v28 = vld [vmem:[%s3283_s5 + $0x108] sm:$0xff] }
 0x183   :  { %1500 = vmatpush1.bf16.msra.mxu0 %v2584_v29  ;;  %v1690_v29 = vld [vmem:[%s3283_s5 + $0x90] sm:$0xff] }
 0x184   :  { %2202 = vmatprep.subr.bf16.mxu0 %v2201_v21 }
 0x1bb   :  { %v1029_v34 = vpop.f32.mrb[4].mxu1 }
 0x1bc   :  { %v2269_v35 = vadd.f32 %v1029_v34, %v209_v32  ;;  %v1031_v36 = vpop.f32.mrb[5].mxu1  ;;  %v2235_v32 = vpack.c.bf16 %v1705_v28, %v1704_v27  ;;  %v1722_v34 = vld [vmem:[%s3283_s5 + $0x190] sm:$0xff] }
 0x1bd   :  { %v2270_v37 = vadd.f32 %v1031_v36, %v213_v33  ;;  %v1033_v38 = vpop.f32.mrb[6].mxu1  ;;  %v1691_v33 = vld [vmem:[%s3283_s5 + $0x98] sm:$0xff] }
 0x1be   :  { %v3012_v39 = vmax.f32 %v2269_v35, 0.0  ;;  %v1034_v45 = vpop.f32.mrb[7].mxu1  ;;  %v1723_v35 = vld [vmem:[%s3283_s5 + $0x198] sm:$0xff]  ;;  %v2205_v36 = vpack.c.bf16 %v1691_v33, %v1690_v29  ;;  %v1674_v38 = vld [vmem:[%s3283_s5 + $0x10] sm:$0xff]  ;;  %2236 = vmatpush3.bf16.msra.mxu1 %v2235_v32  ;;  %v1627_v33 = vunpack.c.0.s8 %v1626_v23 }
 0x1bf   :  { %v3014_v46 = vmax.f32 %v2270_v37, 0.0  ;;  %v2237_v37 = vpack.c.bf16 %v1723_v35, %v1722_v34  ;;  %v1675_v45 = vld [vmem:[%s3283_s5 + $0x18] sm:$0xff]  ;;  %v1698_v23 = vld [vmem:[%s3283_s5 + $0xd0] sm:$0xff] }
 0x1c0   :  { %v1042_v7 = vpack.c.bf16 %v3012_v39, %v3012_v39 }
 0x1c1   :  { %v1043_v47 = vpack.c.bf16 %v3014_v46, %v3014_v46  ;;  %2238 = vmatprep.subr.bf16.mxu1 %v2237_v37 }
 0x1c3   :  { %1501 = vmatprep.mubr.bf16.mxu0 %v1043_v47  ;;  %v1706_v47 = vld [vmem:[%s3283_s5 + $0x110] sm:$0xff] }
 0x1c4   :  { %1502 = vmatmul.mubr.bf16.vlgmr.msra.gmra.mrb[4].mxu0 %v1042_v7  ;;  %v2207_v7 = vpack.c.bf16 %v1675_v45, %v1674_v38  ;;  %v1630_v45 = vsub.s32 %v1627_v33, %v2890_v41  ;;  %v1714_v33 = vld [vmem:[%s3283_s5 + $0x150] sm:$0xff] }
 0x1c5   :  { %2204 = vmatpush3.bf16.msra.mxu0 %v2203_v26 }
 0x1c6   :  { %2206 = vmatprep.subr.bf16.mxu0 %v2205_v36 }
 0x1c9   :  { %2208 = vmatpush3.bf16.msra.mxu0 %v2207_v7 }
 0x297   :  { %v1503_v48 = vpop.f32.mrb[4].mxu0 }
 0x298   :  { %v1505_v43 = vpop.f32.mrb[5].mxu0 }
 0x299   :  { %v2129_v49 = vmul.f32 -1.442695, %v1505_v43  ;;  %v1507_v50 = vpop.f32.mrb[6].mxu0  ;;  %v1692_v43 = vld [vmem:[%s3283_s5 + $0xa0] sm:$0xff] }
 0x29a   :  { %v1508_v51 = vpop.f32.mrb[7].mxu0 }
 0x29b   :  { %2587 = vpow2.f32 %v2129_v49  ;;  %v1693_v49 = vld [vmem:[%s3283_s5 + $0xa8] sm:$0xff] }
 0x29c   :  { %v2209_v51 = vpack.c.bf16 %v1693_v49, %v1692_v43 }
 0x29e   :  { %2210 = vmatprep.subr.bf16.mxu0 %v2209_v51 }
 0x2a5   :  { %v2588_v53 = vpop.eup %2587 }
 0x2a6   :  { %v1513_v54 = vadd.f32 1.0, %v2588_v53  ;;  %v1724_v53 = vld [vmem:[%s3283_s5 + $0x1a0] sm:$0xff] }
 0x2a8   :  { %2589 = vrcp.f32 %v1513_v54  ;;  %v1725_v54 = vld [vmem:[%s3283_s5 + $0x1a8] sm:$0xff] }
 0x2b2   :  { %v2590_v55 = vpop.eup %2589 }
 0x2b3   :  { %v1516_v57 = vmul.f32 %v2590_v55, %v1503_v48  ;;  %v1707_v48 = vld [vmem:[%s3283_s5 + $0x118] sm:$0xff]  ;;  %v1676_v55 = vld [vmem:[%s3283_s5 + $0x20] sm:$0xff] }
 0x2b4   :  { %v2239_v50 = vpack.c.bf16 %v1707_v48, %v1706_v47 }
 0x2b5   :  { %v1524_v59 = vmul.f32 %v2130_v56, %v1516_v57  ;;  %v2241_v56 = vpack.c.bf16 %v1725_v54, %v1724_v53  ;;  %v1677_v57 = vld [vmem:[%s3283_s5 + $0x28] sm:$0xff] }
 0x2b6   :  { %v2211_v62 = vpack.c.bf16 %v1677_v57, %v1676_v55  ;;  %2240 = vmatpush3.bf16.msra.mxu1 %v2239_v50 }
 0x2b7   :  { %1525 = vadd.xlane.f32.xlu0 %v1524_v59  ;;  %v1708_v59 = vld [vmem:[%s3283_s5 + $0x120] sm:$0xff]  ;;  %2242 = vmatprep.subr.bf16.mxu1 %v2241_v56 }
 0x2b8   :  { %2212 = vmatpush3.bf16.msra.mxu0 %v2211_v62 }
 0x344   :  { %v1526_v0 = vpop.xlane.xlu0 %1525 }
 0x345   :  { %v1537_v1 = vrot.slane %v1526_v0, 4  ;;  %1528 = vst.msk [vmem:[%s3285_s7] sm:$0xff] %vm1527_vm1, %v1526_v0 }
 0x347   :  { %v1538_v2 = vmax.f32 %v1526_v0, %v1537_v1  ;;  %v1726_v1 = vld [vmem:[%s3283_s5 + $0x1b0] sm:$0xff] }
 0x349   :  { %v1539_v3 = vrot.slane %v1538_v2, 2 }
 0x34b   :  { %v1540_v4 = vmax.f32 %v1538_v2, %v1539_v3  ;;  %v2243_v2 = vpack.c.bf16 %v1709_v61, %v1708_v59  ;;  %v1575_v59 = vld [vmem:[#allocation4] sm:$0xf] }
 0x34d   :  { %v1541_v5 = vrot.slane %v1540_v4, 1  ;;  %2244 = vmatpush3.bf16.msra.mxu1 %v2243_v2 }
 0x34f   :  { %v1542_v6 = vmax.f32 %v1540_v4, %v1541_v5  ;;  %v1727_v4 = vld [vmem:[%s3283_s5 + $0x1b8] sm:$0xff]  ;;  %v1678_v5 = vld [vmem:[%s3283_s5 + $0x30] sm:$0xff] }
 0x351   :  { %2279 = vpush %v1542_v6  ;;  %v1679_v6 = vld [vmem:[%s3283_s5 + $0x38] sm:$0xff] }
 0x382   :  { %s2280_s4 = spop %2279 }
 0x383   :  { %v1544_v52 = vstv %s2280_s4 }
 0x384   :  { %v1545_v9 = vmax.f32 %v1536_v8, %v1544_v52  ;;  %v1710_v52 = vld [vmem:[%s3283_s5 + $0x130] sm:$0xff] }
 0x386   :  { %v1553_v10 = vrot.slane %v1545_v9, %v2893_v42  ;;  %1654 = vst.msk [vmem:[#allocation2] sm:$0x1] %vm58_vm0, %v1545_v9  ;;  %v1546_v11 = vsub.f32 %v1536_v8, %v1545_v9  ;;  %v2245_v8 = vpack.c.bf16 %v1727_v4, %v1726_v1  ;;  %v1711_v9 = vld [vmem:[%s3283_s5 + $0x138] sm:$0xff] }
 0x388   :  { %v1555_v12 = vsub.f32 %v1526_v0, %v1553_v10  ;;  %v1547_v14 = vmul.f32 1.442695, %v1546_v11  ;;  %v1695_v0 = vld [vmem:[%s3283_s5 + $0xb8] sm:$0xff]  ;;  %v2215_v10 = vpack.c.bf16 %v1679_v6, %v1678_v5  ;;  %v2247_v11 = vpack.c.bf16 %v1711_v9, %v1710_v52  ;;  %2246 = vmatprep.subr.bf16.mxu1 %v2245_v8  ;;  %v1559_v6 = vld [vmem:[#allocation3] sm:$0x1] }
 0x389   :  { %v2213_v3 = vpack.c.bf16 %v1695_v0, %v1694_v63 }
 0x38a   :  { %v1556_v13 = vmul.f32 1.442695, %v1555_v12  ;;  %2248 = vmatpush3.bf16.msra.mxu1 %v2247_v11  ;;  %v1696_v11 = vld [vmem:[%s3283_s5 + $0xc0] sm:$0xff] }
 0x38b   :  { %2214 = vmatprep.subr.bf16.mxu0 %v2213_v3 }
 0x38c   :  { %2591 = vpow2.f32 %v1556_v13  ;;  %2216 = vmatpush3.bf16.msra.mxu0 %v2215_v10 }
 0x38d   :  { %2593 = vpow2.f32 %v1547_v14 }
 0x396   :  { %v2592_v16 = vpop.eup %2591 }
 0x397   :  { %1588 = vperm.xlu1 %2293, %v2592_v16   ;;  %v1561_v17 = vsel %vm1527_vm1, %v2592_v16, 0.0  ;;  %v3039_v18 = vpop.eup %2593 }
 0x398   :  { %1562 = vadd.xlane.f32.xlu0 %v1561_v17  ;;  %v1560_v8 = vmul.f32 %v3039_v18, %v1559_v6 }
 0x39b   :  { %1578 = vperm.xlu1 %2293, %v3039_v18  }
 0x416   :  { %v1589_v12 = vpop.permute.xlu1 %1588 }
 0x417   :  { %v1591_v13 = vmul.f32 %v1589_v12, %v2903_v58  ;;  %v1592_v14 = vmul.f32 %v1589_v12, %v2905_v60  ;;  %v1593_v16 = vmul.f32 %v1589_v12, %v3012_v39  ;;  %v1594_v17 = vmul.f32 %v1589_v12, %v3014_v46  ;;  %v1697_v12 = vld [vmem:[%s3283_s5 + $0xc8] sm:$0xff] }
 0x418   :  { %v2217_v18 = vpack.c.bf16 %v1697_v12, %v1696_v11 }
 0x419   :  { %v1595_v19 = vrot.slane %v1591_v13, 4  ;;  %v1601_v40 = vrot.slane %v1592_v14, 4  ;;  %v1607_v20 = vrot.slane %v1593_v16, 4  ;;  %v1613_v21 = vrot.slane %v1594_v17, 4 }
 0x41a   :  { %v1579_v49 = vpop.permute.xlu1 %1578  ;;  %2218 = vmatprep.subr.bf16.mxu0 %v2217_v18 }
 0x41b   :  { %v1596_v24 = vadd.f32 %v1595_v19, %v1591_v13  ;;  %v1602_v25 = vadd.f32 %v1601_v40, %v1592_v14  ;;  %v1608_v26 = vadd.f32 %v1607_v20, %v1593_v16  ;;  %v1614_v27 = vadd.f32 %v1613_v21, %v1594_v17  ;;  %v1728_v13 = vld [vmem:[%s3283_s5 + $0x1c0] sm:$0xff]  ;;  %v1729_v14 = vld [vmem:[%s3283_s5 + $0x1c8] sm:$0xff] }
 0x41c   :  { %v1584_v57 = vrot.slane %v1579_v49, %v2893_v42  ;;  %v1680_v16 = vld [vmem:[%s3283_s5 + $0x40] sm:$0xff]  ;;  %v1681_v17 = vld [vmem:[%s3283_s5 + $0x48] sm:$0xff]  ;;  %v2249_v19 = vpack.c.bf16 %v1729_v14, %v1728_v13 }
 0x41d   :  { %v1597_v28 = vrot.slane %v1596_v24, 2  ;;  %v1603_v29 = vrot.slane %v1602_v25, 2  ;;  %v1609_v32 = vrot.slane %v1608_v26, 2  ;;  %v1615_v58 = vrot.slane %v1614_v27, 2  ;;  %v1712_v20 = vld [vmem:[%s3283_s5 + $0x140] sm:$0xff]  ;;  %v1713_v21 = vld [vmem:[%s3283_s5 + $0x148] sm:$0xff] }
 0x41e   :  { %v1585_v1 = vmul.f32 %v1584_v57, %v1575_v59  ;;  %v2219_v40 = vpack.c.bf16 %v1681_v17, %v1680_v16  ;;  %v2251_v22 = vpack.c.bf16 %v1713_v21, %v1712_v20  ;;  %2250 = vmatprep.subr.bf16.mxu1 %v2249_v19  ;;  %v1687_v57 = vld [vmem:[%s3283_s5 + $0x78] sm:$0xff] }
 0x41f   :  { %v1598_v60 = vadd.f32 %v1597_v28, %v1596_v24  ;;  %v1604_v34 = vadd.f32 %v1603_v29, %v1602_v25  ;;  %v1610_v39 = vadd.f32 %v1609_v32, %v1608_v26  ;;  %v1616_v35 = vadd.f32 %v1615_v58, %v1614_v27  ;;  %v1699_v24 = vld [vmem:[%s3283_s5 + $0xd8] sm:$0xff]  ;;  %v1730_v25 = vld [vmem:[%s3283_s5 + $0x1d0] sm:$0xff] }
 0x420   :  { %2220 = vmatpush3.bf16.msra.mxu0 %v2219_v40  ;;  %2252 = vmatpush3.bf16.msra.mxu1 %v2251_v22  ;;  %v2221_v26 = vpack.c.bf16 %v1699_v24, %v1698_v23  ;;  %v1731_v27 = vld [vmem:[%s3283_s5 + $0x1d8] sm:$0xff]  ;;  %v1682_v28 = vld [vmem:[%s3283_s5 + $0x50] sm:$0xff] }
 0x421   :  { %v1599_v46 = vrot.slane %v1598_v60, 1  ;;  %v1605_v36 = vrot.slane %v1604_v34, 1  ;;  %v1611_v37 = vrot.slane %v1610_v39, 1  ;;  %v1617_v38 = vrot.slane %v1616_v35, 1  ;;  %v1683_v29 = vld [vmem:[%s3283_s5 + $0x58] sm:$0xff] }
 0x422   :  { %v2253_v32 = vpack.c.bf16 %v1731_v27, %v1730_v25  ;;  %v2223_v58 = vpack.c.bf16 %v1683_v29, %v1682_v28  ;;  %2222 = vmatprep.subr.bf16.mxu0 %v2221_v26 }
 0x423   :  { %v1600_v47 = vadd.f32 %v1599_v46, %v1598_v60  ;;  %v1606_v7 = vadd.f32 %v1605_v36, %v1604_v34  ;;  %v1612_v48 = vadd.f32 %v1611_v37, %v1610_v39  ;;  %v1618_v43 = vadd.f32 %v1617_v38, %v1616_v35  ;;  %v1715_v60 = vld [vmem:[%s3283_s5 + $0x158] sm:$0xff]  ;;  %v1700_v39 = vld [vmem:[%s3283_s5 + $0xe0] sm:$0xff]  ;;  %v1701_v35 = vld [vmem:[%s3283_s5 + $0xe8] sm:$0xff] }
 0x424   :  { %v2255_v34 = vpack.c.bf16 %v1715_v60, %v1714_v33  ;;  %2254 = vmatprep.subr.bf16.mxu1 %v2253_v32  ;;  %2224 = vmatpush3.bf16.msra.mxu0 %v2223_v58  ;;  %v1732_v46 = vld [vmem:[%s3283_s5 + $0x1e0] sm:$0xff]  ;;  %v2225_v36 = vpack.c.bf16 %v1701_v35, %v1700_v39  ;;  %v1733_v37 = vld [vmem:[%s3283_s5 + $0x1e8] sm:$0xff] }
 0x425   :  { %v1623_v50 = vcombine.low %v1600_v47, %v1606_v7  ;;  %v1624_v51 = vcombine.low %v1612_v48, %v1618_v43  ;;  %v1563_v53 = vpop.xlane.xlu0 %1562  ;;  %v1684_v38 = vld [vmem:[%s3283_s5 + $0x60] sm:$0xff]  ;;  %v2257_v47 = vpack.c.bf16 %v1733_v37, %v1732_v46  ;;  %v1717_v43 = vld [vmem:[%s3283_s5 + $0x168] sm:$0xff] }
 0x426   :  { %v1564_v54 = vrot.slane %v1563_v53, 4  ;;  %2256 = vmatpush3.bf16.msra.mxu1 %v2255_v34  ;;  %v1716_v48 = vld [vmem:[%s3283_s5 + $0x160] sm:$0xff]  ;;  %2226 = vmatprep.subr.bf16.mxu0 %v2225_v36 }
 0x427   :  { %v1631_v55 = vrot.slane %v1623_v50, %v1630_v45  ;;  %v1638_v56 = vrot.slane %v1624_v51, %v1630_v45  ;;  %v2259_v49 = vpack.c.bf16 %v1717_v43, %v1716_v48  ;;  %2258 = vmatprep.subr.bf16.mxu1 %v2257_v47  ;;  %v1702_v50 = vld [vmem:[%s3283_s5 + $0xf0] sm:$0xff]  ;;  %v1703_v51 = vld [vmem:[%s3283_s5 + $0xf8] sm:$0xff] }
 0x428   :  { %v1565_v61 = vadd.f32 %v1564_v54, %v1563_v53  ;;  %v1734_v53 = vld [vmem:[%s3283_s5 + $0x1f0] sm:$0xff]  ;;  %v2229_v54 = vpack.c.bf16 %v1703_v51, %v1702_v50 }
 0x429   :  { %v1639_v62 = vcombine.low %v1631_v55, %v1638_v56  ;;  %v1735_v55 = vld [vmem:[%s3283_s5 + $0x1f8] sm:$0xff]  ;;  %v1686_v56 = vld [vmem:[%s3283_s5 + $0x70] sm:$0xff] }
 0x42a   :  { %v1566_v63 = vrot.slane %v1565_v61, 2  ;;  %2260 = vmatpush3.bf16.msra.mxu1 %v2259_v49  ;;  %v2261_v59 = vpack.c.bf16 %v1735_v55, %v1734_v53 }
 0x42b   :  { %v1646_v0 = vrot.slane %v1639_v62, %v1630_v45  ;;  %v1685_v45 = vld [vmem:[%s3283_s5 + $0x68] sm:$0xff]  ;;  %v1718_v62 = vld [vmem:[%s3283_s5 + $0x170] sm:$0xff] }
 0x42c   :  { %v1567_v2 = vadd.f32 %v1566_v63, %v1565_v61  ;;  %v2227_v7 = vpack.c.bf16 %v1685_v45, %v1684_v38  ;;  %v2231_v61 = vpack.c.bf16 %v1687_v57, %v1686_v56  ;;  %v1719_v63 = vld [vmem:[%s3283_s5 + $0x178] sm:$0xff]  ;;  %2262 = vmatprep.subr.bf16.mxu1 %v2261_v59  ;;  %s2701_s5 = smov [#allocation11]  }
 0x42d   :  { %v1648_v3 = vadd.f32 %v1646_v0, %v1585_v1  ;;  %v2263_v0 = vpack.c.bf16 %v1719_v63, %v1718_v62  ;;  %s1917_s30 = sshll.u32 %s2701_s5, 4  ;;  %s1918_s30 = int_to_ptr.vmem [resolvable:$true] %s1917_s30 }
 0x42e   :  { %v1568_v4 = vrot.slane %v1567_v2, 1  ;;  %2228 = vmatpush3.bf16.msra.mxu0 %v2227_v7  ;;  %s2641_s9 = scalar_lea.vmem %s1918_s30, 64  ;;  %p2646_p3 = scmp.lt.s32.totalorder %s1918_s30, %s1918_s30 }
 0x42f   :  { %1653 = vst.msk [vmem:[#allocation4] sm:$0xf] %vm3032_vm2, %v1648_v3  ;;  %2230 = vmatprep.subr.bf16.mxu0 %v2229_v54  ;;  %2264 = vmatpush3.bf16.msra.mxu1 %v2263_v0  ;;  %p2642_p2 = scmp.ne.s32.totalorder %s1918_s30, %s2641_s9  ;;  %p2647_p4 = scmp.lt.s32.totalorder %s2641_s9, %s2641_s9 }
 0x430   :  { %v1569_v5 = vadd.f32 %v1568_v4, %v1567_v2 }
 0x431   :  { %p2648_p5 = por %p2647_p4, %p2646_p3 }
 0x432   :  { %2281 = vpush %v1569_v5  ;;  %2232 = vmatpush3.bf16.msra.mxu0 %v2231_v61 }
 0x433   :  { %p2649_p6 = pnand %p2648_p5, %p2642_p2 }
 0x436   :  { %v1658_v4 = vld [vmem:[#allocation4] sm:$0xf] }
 0x463   :  { %s2282_s23 = spop %2281 }
 0x464   :  { %v1571_v52 = vstv %s2282_s23 }
 0x465   :  { %v1572_v9 = vadd.f32 %v1571_v52, %v1560_v8 }
 0x467   :  { %1574 = vst.msk [vmem:[#allocation3] sm:$0x1] %vm58_vm0, %v1572_v9 }
 0x46e   :  { %v1659_v10 = vld [vmem:[#allocation3] sm:$0x1] }
 0x46f   :  { %1662 = vperm.xlu0 %2294, %v1659_v10  }
 0x4ee   :  { %v1663_v1 = vpop.permute.xlu0 %1662 }
 0x4ef   :  { %v1668_v2 = vrot.slane %v1663_v1, %v2893_v42 }
 0x4f1   :  { %2595 = vrcp.f32 %v1668_v2 }
 0x4fb   :  { %v2596_v3 = vpop.eup %2595 }
 0x4fc   :  { %v1670_v5 = vmul.f32 %v2596_v3, %v1658_v4 }
 0x4fe   :  { %1671 = vst.msk [vmem:[#allocation11] sm:$0xf] %vm3032_vm2, %v1670_v5  ;;  %v1744_v6 = vrot.slane %v1670_v5, %v204_v44  ;;  %v1752_v8 = vrot.slane %v1670_v5, %v212_v31  ;;  %v1740_v52 = vrot.slane %v1670_v5, %v2893_v42  ;;  %v1748_v9 = vrot.slane %v1670_v5, %v208_v30 }
 0x500   :  { %1821 = vmatprep.mubr.f32.mxu0 %v1744_v6  ;;  %1891 = vmatprep.mubr.f32.mxu1 %v1752_v8 }
 0x501   :  { %1822 = vmatmul.mubr.f32.vlgmr.msra.gmra.mrb[8].mxu0 %v1740_v52  ;;  %1892 = vmatmul.mubr.f32.vlgmr.msra.gmra.mrb[8].mxu1 %v1748_v9 }
 0x502   :  { %2652 = shalt.err (!%p2649_p6)
}
 0x503   :  { %s2653_s11 = scalar_lea.hbm %s3286_s8, 64 }
 0x504   :  { %p2654_p7 = scmp.ne.s32.totalorder %s3286_s8, %s2653_s11  ;;  %p2657_p8 = scmp.lt.u32.totalorder %s2653_s11, %s3286_s8 }
 0x506   :  { %p2659_p9 = pnand %p2657_p8, %p2654_p7 }
 0x508   :  { %2662 = shalt.err (!%p2659_p9)
}
 0x509   :  { %1920 = dma.vmem_to_hbm [thread:$0]  %s1918_s30, 64, %s3286_s8, [#allocation12]   ;;  %vm1897_vm3 = vcmask 8192  }
 0x50a   :  { %s2702_s7 = smov [#allocation10]  }
 0x50b   :  { %s1905_s16 = sshll.u32 %s2702_s7, 4  ;;  %s1906_s16 = int_to_ptr.vmem [resolvable:$true] %s1905_s16 }
 0x50c   :  { %s2663_s17 = scalar_lea.vmem %s1906_s16, 16  ;;  %s2667_s18 = scalar_lea.vmem %s1906_s16, 32 }
 0x50d   :  { %p2664_p10 = scmp.ne.s32.totalorder %s1906_s16, %s2663_s17  ;;  %p2668_p11 = scmp.lt.s32.totalorder %s1906_s16, %s1906_s16 }
 0x50e   :  { %p2669_p12 = scmp.lt.s32.totalorder %s2667_s18, %s2663_s17 }
 0x510   :  { %p2670_p13 = por %p2669_p12, %p2668_p11 }
 0x512   :  { %p2671_p0 = pnand %p2670_p13, %p2664_p10 }
 0x5d4   :  { %v2163_v41 = vpop.f32.mrb[8].mxu0  ;;  %v2198_v42 = vpop.f32.mrb[8].mxu1 }
 0x5d5   :  { %v2164_v44 = vpop.f32.mrb[9].mxu0  ;;  %v2199_v30 = vpop.f32.mrb[9].mxu1 }
 0x5d6   :  { %v2165_v31 = vadd.f32 %v2164_v44, %v2163_v41  ;;  %v2200_v15 = vadd.f32 %v2199_v30, %v2198_v42 }
 0x5d8   :  { %v1894_v10 = vadd.f32 %v2200_v15, %v2165_v31 }
 0x5da   :  { %1898 = vst.msk [vmem:[#allocation10] sm:$0x1] %vm1897_vm3, %v1894_v10 }
 0x5db   :  { %2674 = shalt.err (!%p2671_p0)
}
 0x5dc   :  { %s2675_s20 = scalar_lea.hbm %s3284_s6, 16 }
 0x5dd   :  { %p2676_p1 = scmp.ne.s32.totalorder %s3284_s6, %s2675_s20  ;;  %p2679_p2 = scmp.lt.u32.totalorder %s2675_s20, %s3284_s6 }
 0x5df   :  { %p2681_p3 = pnand %p2679_p2, %p2676_p1 }
 0x5e1   :  { %2684 = shalt.err (!%p2681_p3)
}
 0x5e2   :  { %1908 = dma.vmem_to_hbm [thread:$0]  %s1906_s16, 16, %s3284_s6, [#allocation7]  }
 0x5e3   :  { %2689 = dma.done.wait [#allocation7], 16  }
 0x5e4   :  { %2690 = vsyncadd [#allocation7], 4294967280 }
 0x5e5   :  { %2691 = dma.done.wait [#allocation12], 64  }
 0x5e6   :  { %2692 = vsyncadd [#allocation12], 4294967232 }
 0x5e7   :  { %1929 = vsyncpa [#allocation6], 1 }
 0x5e8   :  { %1930 = vsyncpa [#allocation9], 1 }
 0x5e9   :  { %1931 = vsyncpa [#allocation7], 1 }
 0x5ea   :  { %1932 = vsyncpa [#allocation12], 1 }

</bundles_post_ra>
